<compile_context>
chip_gen: v6e
topology: v6e:2x2x1
jax: 0.10.0
libtpu: 0.0.40
codegen_flags: <defaults>
</compile_context>

<pallas_src>
import jax
import jax.numpy as jnp
from jax import lax
from jax.experimental import pallas as pl
from jax.experimental.pallas import tpu as pltpu

LAYNORM_EPS = 1e-12
TAU = 2.0            # SPS uses MultiStepLIFNode(tau=2.0)
V_THRESHOLD = 1.0


def _round_up(x, m):
    return ((x + m - 1) // m) * m


def _tpu_defaults():
    """Per-generation tile / VMEM budget.

    v7x has only 64 MiB VMEM per TensorCore -> halve the budget and the max
    row tile vs v5e/v6e (128 MiB VMEM).
    """
    try:
        kind = jax.devices()[0].device_kind.lower()
    except Exception:
        kind = ""
    if "v7" in kind:
        return {"max_rows": 256, "vmem_limit": 32 * 1024 * 1024}
    # v5e / v6e (and unknown): 128 MiB physical VMEM.
    return {"max_rows": 512, "vmem_limit": 64 * 1024 * 1024}


def _pick_tile_rows(n_rows, d, t, out_bytes, cfg):
    """Largest multiple-of-16 row tile whose per-step working set
    (double-buffered output block + f32 y/v scratch) fits ~half the budget."""
    per_row = 2 * t * d * out_bytes + 2 * d * 4 + 4
    rows = (cfg["vmem_limit"] // 2) // max(per_row, 1)
    rows = min(rows, cfg["max_rows"], _round_up(n_rows, 16))
    return max(16, (rows // 16) * 16)


def _sps_kernel(tok_ref, emb_ref, w_ref, b_ref, g_ref, beta_ref,
                out_ref, y_ref, v_ref):
    """Fused Embedding-gather + Linear + LayerNorm + T-step LIF for one row tile.

    tok_ref : (TILE_N, 1) int32   token ids of this row tile
    emb_ref : (V, D)  f32         embedding table (replicated, VMEM resident)
    w_ref   : (D, D)  f32         fc weight, PyTorch (out, in) layout
    b_ref   : (1, D)  f32         fc bias
    g_ref   : (1, D)  f32         LayerNorm gamma
    beta_ref: (1, D)  f32         LayerNorm beta
    out_ref : (T, TILE_N, D)      spikes (narrow dtype, e.g. bf16)
    y_ref   : (TILE_N, D) f32     VMEM scratch: LayerNorm output
    v_ref   : (TILE_N, D) f32     VMEM scratch: LIF membrane potential
    """
    tile_n = tok_ref.shape[0]
    vocab = emb_ref.shape[0]

    # --- fused embedding gather: one_hot(tokens) @ table on the MXU (exact) ---
    tok = tok_ref[...]                                            # (TILE_N, 1)
    lane_ids = lax.broadcasted_iota(jnp.int32, (tile_n, vocab), 1)
    one_hot = (lane_ids == tok).astype(jnp.float32)               # (TILE_N, V)
    x = jnp.dot(one_hot, emb_ref[...],
                preferred_element_type=jnp.float32,
                precision=lax.Precision.HIGHEST)                  # (TILE_N, D)

    # --- Linear with PyTorch-layout weight (no transposed copy): y = x @ W^T + b
    h = lax.dot_general(x, w_ref[...], (((1,), (1,)), ((), ())),
                        preferred_element_type=jnp.float32,
                        precision=lax.Precision.HIGHEST) + b_ref[...]

    # --- LayerNorm over D (biased variance, eps inside rsqrt) ---
    mean = jnp.mean(h, axis=-1, keepdims=True)
    var = jnp.mean(jnp.square(h - mean), axis=-1, keepdims=True)
    y_ref[...] = (h - mean) * lax.rsqrt(var + LAYNORM_EPS) * g_ref[...] + beta_ref[...]

    # --- Multi-step LIF.  The same y drives every step (the PyTorch module
    #     repeats it T times before the LIF node).  y / v are kept in VMEM
    #     scratch and reloaded each step so the unrolled loop does not hold
    #     big live values in vregs. ---
    v_ref[...] = jnp.zeros_like(v_ref)
    inv_tau = 1.0 / TAU
    for t in range(out_ref.shape[0]):                 # T is small & static
        y = y_ref[...]
        v = v_ref[...]
        h_mem = v + (y - v) * inv_tau                 # decayed charge
        spike = h_mem >= V_THRESHOLD
        out_ref[t, :, :] = jnp.where(spike, 1.0, 0.0).astype(out_ref.dtype)
        v_ref[...] = jnp.where(spike, 0.0, h_mem)     # hard reset (v_reset = 0)


def sps_forward(tokens, emb_w, fc_w, fc_b, ln_g, ln_b, time_step,
                *, out_dtype=jnp.bfloat16, tile_n=None):
    """SPS forward: tokens (B, L) int32 -> spikes (T, B, L, D) in `out_dtype`.

    Spikes are exactly 0/1 so bfloat16 output is lossless (halves writeback).
    """
    B, L = tokens.shape
    V, D = emb_w.shape
    N = B * L
    out_bytes = jnp.dtype(out_dtype).itemsize

    cfg = _tpu_defaults()
    if tile_n is None:
        tile_n = _pick_tile_rows(N, D, time_step, out_bytes, cfg)
    if tile_n % 16 != 0:
        raise ValueError("tile_n must be a multiple of 16")

    npad = _round_up(N, tile_n)
    tok = tokens.reshape(-1).astype(jnp.int32)
    if npad != N:
        tok = jnp.pad(tok, (0, npad - N))              # pad rows with token 0
    tok = tok.reshape(npad, 1)

    grid = (npad // tile_n,)
    out = pl.pallas_call(
        _sps_kernel,
        out_shape=jax.ShapeDtypeStruct((time_step, npad, D), out_dtype),
        grid_spec=pltpu.PrefetchScalarGridSpec(
            num_scalar_prefetch=0,
            grid=grid,
            in_specs=[
                pl.BlockSpec((tile_n, 1), lambda i: (i, 0)),   # token ids (tiled)
                pl.BlockSpec((V, D), lambda i: (0, 0)),        # embedding table
                pl.BlockSpec((D, D), lambda i: (0, 0)),        # fc weight (out,in)
                pl.BlockSpec((1, D), lambda i: (0, 0)),        # fc bias
                pl.BlockSpec((1, D), lambda i: (0, 0)),        # LN gamma
                pl.BlockSpec((1, D), lambda i: (0, 0)),        # LN beta
            ],
            out_specs=pl.BlockSpec((time_step, tile_n, D), lambda i: (0, i, 0)),
            scratch_shapes=[
                pltpu.VMEM((tile_n, D), jnp.float32),          # y  (LN output)
                pltpu.VMEM((tile_n, D), jnp.float32),          # v  (membrane)
            ],
        ),
        compiler_params=pltpu.CompilerParams(
            dimension_semantics=("parallel",),                 # shard N across TCs
            vmem_limit_bytes=cfg["vmem_limit"],
        ),
    )(
        tok,
        emb_w,
        fc_w,                       # PyTorch layout; NT dot_general in-kernel
        fc_b.reshape(1, D),
        ln_g.reshape(1, D),
        ln_b.reshape(1, D),
    )

    return out[:, :N, :].reshape(time_step, B, L, D)


def sps_reference(tokens, emb_w, fc_w, fc_b, ln_g, ln_b, time_step):
    """Pure-JAX reference of the PyTorch SPS forward."""
    x = jnp.take(emb_w, tokens, axis=0)                              # (B, L, D)
    x = lax.dot_general(x, fc_w, (((2,), (1,)), ((), ())),
                        precision=lax.Precision.HIGHEST) + fc_b      # Linear
    mean = jnp.mean(x, axis=-1, keepdims=True)
    var = jnp.mean(jnp.square(x - mean), axis=-1, keepdims=True)
    x = (x - mean) * lax.rsqrt(var + LAYNORM_EPS) * ln_g + ln_b
    v = jnp.zeros_like(x)
    outs = []
    for _ in range(time_step):
        h = v + (x - v) / TAU
        s = (h >= V_THRESHOLD).astype(jnp.float32)
        v = h * (1.0 - s)
        outs.append(s)
    return jnp.stack(outs, axis=0)                                   # (T, B, L, D)


if __name__ == "__main__":
    # Small config consistent with the module: vocab=32, hidden=32, T=4.
    # B=4, L=15 gives N=60 rows, exercising the row-padding path.
    VOCAB, HIDDEN, TIME_STEP = 32, 32, 4
    B, L = 4, 15

    key = jax.random.PRNGKey(0)
    k_tok, k_emb, k_w, k_b = jax.random.split(key, 4)

    tokens = jax.random.randint(k_tok, (B, L), 0, VOCAB, dtype=jnp.int32)
    emb_w = jax.random.normal(k_emb, (VOCAB, HIDDEN), dtype=jnp.float32)
    fc_w = jax.random.normal(k_w, (HIDDEN, HIDDEN), dtype=jnp.float32) * 0.2
    fc_b = jax.random.normal(k_b, (HIDDEN,), dtype=jnp.float32) * 0.1
    ln_g = jnp.ones((HIDDEN,), dtype=jnp.float32)    # PyTorch LayerNorm init
    ln_b = jnp.zeros((HIDDEN,), dtype=jnp.float32)

    ref = sps_reference(tokens, emb_w, fc_w, fc_b, ln_g, ln_b, TIME_STEP)

    # Run with the auto (generation-aware) tile and with an explicit small
    # tile that exercises a multi-step grid + padded final tile.
    for tn in (None, 16):
        out = sps_forward(tokens, emb_w, fc_w, fc_b, ln_g, ln_b, TIME_STEP,
                          tile_n=tn)
        out = jax.block_until_ready(out)
        assert out.shape == (TIME_STEP, B, L, HIDDEN), out.shape
        assert jnp.allclose(out.astype(jnp.float32), ref), \
            "mismatch vs. pure-JAX reference"

    print("KERNEL_OK")
</pallas_src>

<mosaic_0001>
module attributes {stable_mosaic.version = 11 : i64} {
  func.func @_sps_kernel(%arg0: i32, %arg1: memref<64x1xi32, #tpu.memory_space<vmem>>, %arg2: memref<32x32xf32, #tpu.memory_space<vmem>>, %arg3: memref<32x32xf32, #tpu.memory_space<vmem>>, %arg4: memref<1x32xf32, #tpu.memory_space<vmem>>, %arg5: memref<1x32xf32, #tpu.memory_space<vmem>>, %arg6: memref<1x32xf32, #tpu.memory_space<vmem>>, %arg7: memref<4x64x32xbf16, #tpu.memory_space<vmem>>, %arg8: memref<64x32xf32, #tpu.memory_space<vmem>>, %arg9: memref<64x32xf32, #tpu.memory_space<vmem>>) attributes {dimension_semantics = [#tpu.dimension_semantics<parallel>], iteration_bounds = array<i64: 1>, scalar_prefetch = 0 : i64, scratch_operands = 2 : i64, tpu.core_type = #tpu.core_type<tc>, window_params = [{transform_indices = @transform_0, window_bounds = array<i64: 64, 1>}, {pipeline_mode = #tpu.pipeline_mode<synchronous>, transform_indices = @transform_1, window_bounds = array<i64: 32, 32>}, {pipeline_mode = #tpu.pipeline_mode<synchronous>, transform_indices = @transform_2, window_bounds = array<i64: 32, 32>}, {pipeline_mode = #tpu.pipeline_mode<synchronous>, transform_indices = @transform_3, window_bounds = array<i64: 1, 32>}, {pipeline_mode = #tpu.pipeline_mode<synchronous>, transform_indices = @transform_4, window_bounds = array<i64: 1, 32>}, {pipeline_mode = #tpu.pipeline_mode<synchronous>, transform_indices = @transform_5, window_bounds = array<i64: 1, 32>}, {transform_indices = @transform_6, window_bounds = array<i64: 4, 64, 32>}]} {
    %c0 = arith.constant 0 : index
    %c0_0 = arith.constant 0 : index
    %0 = vector.load %arg1[%c0, %c0_0] : memref<64x1xi32, #tpu.memory_space<vmem>>, vector<64x1xi32>
    %1 = tpu.iota {dimensions = array<i32: 1>} : vector<64x32xi32>
    %2 = vector.broadcast %0 : vector<64x1xi32> to vector<64x32xi32>
    %3 = arith.cmpi eq, %1, %2 : vector<64x32xi32>
    %4 = arith.extui %3 : vector<64x32xi1> to vector<64x32xi32>
    %5 = arith.sitofp %4 : vector<64x32xi32> to vector<64x32xf32>
    %c0_1 = arith.constant 0 : index
    %c0_2 = arith.constant 0 : index
    %6 = vector.load %arg2[%c0_1, %c0_2] : memref<32x32xf32, #tpu.memory_space<vmem>>, vector<32x32xf32>
    %cst = arith.constant dense<0.000000e+00> : vector<64x32xf32>
    %7 = tpu.matmul %5, %6, %cst {dimension_numbers = #tpu.dot_dimension_numbers<[1], [0], [0], [1], [0, 0, 1, 1], [], []>, precision = #tpu.contract_precision<fp32>} : vector<64x32xf32>, vector<32x32xf32>, vector<64x32xf32> -> vector<64x32xf32>
    %c0_3 = arith.constant 0 : index
    %c0_4 = arith.constant 0 : index
    %8 = vector.load %arg3[%c0_3, %c0_4] : memref<32x32xf32, #tpu.memory_space<vmem>>, vector<32x32xf32>
    %cst_5 = arith.constant dense<0.000000e+00> : vector<64x32xf32>
    %9 = tpu.matmul %7, %8, %cst_5 {dimension_numbers = #tpu.dot_dimension_numbers<[1], [1], [0], [0], [0, 0, 1, 0], [], []>, precision = #tpu.contract_precision<fp32>} : vector<64x32xf32>, vector<32x32xf32>, vector<64x32xf32> -> vector<64x32xf32>
    %c0_6 = arith.constant 0 : index
    %c0_7 = arith.constant 0 : index
    %10 = vector.load %arg4[%c0_6, %c0_7] : memref<1x32xf32, #tpu.memory_space<vmem>>, vector<1x32xf32>
    %11 = vector.broadcast %10 : vector<1x32xf32> to vector<64x32xf32>
    %12 = arith.addf %9, %11 : vector<64x32xf32>
    %cst_8 = arith.constant dense<0.000000e+00> : vector<64xf32>
    %13 = vector.multi_reduction <add>, %12, %cst_8 [1] : vector<64x32xf32> to vector<64xf32>
    %14 = vector.shape_cast %13 : vector<64xf32> to vector<64x1xf32>
    %cst_9 = arith.constant 3.200000e+01 : f32
    %15 = vector.broadcast %cst_9 : f32 to vector<64x1xf32>
    %16 = arith.divf %14, %15 : vector<64x1xf32>
    %17 = vector.broadcast %16 : vector<64x1xf32> to vector<64x32xf32>
    %18 = arith.subf %12, %17 : vector<64x32xf32>
    %19 = arith.mulf %18, %18 : vector<64x32xf32>
    %cst_10 = arith.constant dense<0.000000e+00> : vector<64xf32>
    %20 = vector.multi_reduction <add>, %19, %cst_10 [1] : vector<64x32xf32> to vector<64xf32>
    %21 = vector.shape_cast %20 : vector<64xf32> to vector<64x1xf32>
    %cst_11 = arith.constant 3.200000e+01 : f32
    %22 = vector.broadcast %cst_11 : f32 to vector<64x1xf32>
    %23 = arith.divf %21, %22 : vector<64x1xf32>
    %24 = vector.broadcast %16 : vector<64x1xf32> to vector<64x32xf32>
    %25 = arith.subf %12, %24 : vector<64x32xf32>
    %cst_12 = arith.constant 9.99999996E-13 : f32
    %26 = vector.broadcast %cst_12 : f32 to vector<64x1xf32>
    %27 = arith.addf %23, %26 : vector<64x1xf32>
    %28 = math.rsqrt %27 : vector<64x1xf32>
    %29 = vector.broadcast %28 : vector<64x1xf32> to vector<64x32xf32>
    %30 = arith.mulf %25, %29 : vector<64x32xf32>
    %c0_13 = arith.constant 0 : index
    %c0_14 = arith.constant 0 : index
    %31 = vector.load %arg5[%c0_13, %c0_14] : memref<1x32xf32, #tpu.memory_space<vmem>>, vector<1x32xf32>
    %32 = vector.broadcast %31 : vector<1x32xf32> to vector<64x32xf32>
    %33 = arith.mulf %30, %32 : vector<64x32xf32>
    %c0_15 = arith.constant 0 : index
    %c0_16 = arith.constant 0 : index
    %34 = vector.load %arg6[%c0_15, %c0_16] : memref<1x32xf32, #tpu.memory_space<vmem>>, vector<1x32xf32>
    %35 = vector.broadcast %34 : vector<1x32xf32> to vector<64x32xf32>
    %36 = arith.addf %33, %35 : vector<64x32xf32>
    %c0_17 = arith.constant 0 : index
    %c0_18 = arith.constant 0 : index
    %37 = vector.load %arg8[%c0_17, %c0_18] : memref<64x32xf32, #tpu.memory_space<vmem>>, vector<64x32xf32>
    tpu.vector_store %arg8[%c0_17, %c0_18], %36 {strides = array<i32>} : memref<64x32xf32, #tpu.memory_space<vmem>>, vector<64x32xf32>,
    %cst_19 = arith.constant 0.000000e+00 : f32
    %38 = vector.broadcast %cst_19 : f32 to vector<64x32xf32>
    %c0_20 = arith.constant 0 : index
    %c0_21 = arith.constant 0 : index
    %39 = vector.load %arg9[%c0_20, %c0_21] : memref<64x32xf32, #tpu.memory_space<vmem>>, vector<64x32xf32>
    tpu.vector_store %arg9[%c0_20, %c0_21], %38 {strides = array<i32>} : memref<64x32xf32, #tpu.memory_space<vmem>>, vector<64x32xf32>,
    %c0_22 = arith.constant 0 : index
    %c0_23 = arith.constant 0 : index
    %40 = vector.load %arg8[%c0_22, %c0_23] : memref<64x32xf32, #tpu.memory_space<vmem>>, vector<64x32xf32>
    %c0_24 = arith.constant 0 : index
    %c0_25 = arith.constant 0 : index
    %41 = vector.load %arg9[%c0_24, %c0_25] : memref<64x32xf32, #tpu.memory_space<vmem>>, vector<64x32xf32>
    %42 = arith.subf %40, %41 : vector<64x32xf32>
    %cst_26 = arith.constant 5.000000e-01 : f32
    %43 = vector.broadcast %cst_26 : f32 to vector<64x32xf32>
    %44 = arith.mulf %42, %43 : vector<64x32xf32>
    %45 = arith.addf %41, %44 : vector<64x32xf32>
    %cst_27 = arith.constant 1.000000e+00 : f32
    %46 = vector.broadcast %cst_27 : f32 to vector<64x32xf32>
    %47 = arith.cmpf oge, %45, %46 : vector<64x32xf32>
    %cst_28 = arith.constant 1.000000e+00 : f32
    %cst_29 = arith.constant 0.000000e+00 : f32
    %48 = vector.broadcast %cst_28 : f32 to vector<64x32xf32>
    %49 = vector.broadcast %cst_29 : f32 to vector<64x32xf32>
    %50 = arith.select %47, %48, %49 : vector<64x32xi1>, vector<64x32xf32>
    %51 = arith.truncf %50 : vector<64x32xf32> to vector<64x32xbf16>
    %c0_30 = arith.constant 0 : index
    %c0_31 = arith.constant 0 : index
    %c0_32 = arith.constant 0 : index
    %52 = vector.load %arg7[%c0_30, %c0_31, %c0_32] : memref<4x64x32xbf16, #tpu.memory_space<vmem>>, vector<1x64x32xbf16>
    %53 = vector.shape_cast %52 : vector<1x64x32xbf16> to vector<64x32xbf16>
    %54 = vector.shape_cast %51 : vector<64x32xbf16> to vector<1x64x32xbf16>
    tpu.vector_store %arg7[%c0_30, %c0_31, %c0_32], %54 {strides = array<i32>} : memref<4x64x32xbf16, #tpu.memory_space<vmem>>, vector<1x64x32xbf16>,
    %cst_33 = arith.constant 0.000000e+00 : f32
    %55 = vector.broadcast %cst_33 : f32 to vector<64x32xf32>
    %56 = arith.select %47, %55, %45 : vector<64x32xi1>, vector<64x32xf32>
    %c0_34 = arith.constant 0 : index
    %c0_35 = arith.constant 0 : index
    %57 = vector.load %arg9[%c0_34, %c0_35] : memref<64x32xf32, #tpu.memory_space<vmem>>, vector<64x32xf32>
    tpu.vector_store %arg9[%c0_34, %c0_35], %56 {strides = array<i32>} : memref<64x32xf32, #tpu.memory_space<vmem>>, vector<64x32xf32>,
    %c0_36 = arith.constant 0 : index
    %c0_37 = arith.constant 0 : index
    %58 = vector.load %arg8[%c0_36, %c0_37] : memref<64x32xf32, #tpu.memory_space<vmem>>, vector<64x32xf32>
    %c0_38 = arith.constant 0 : index
    %c0_39 = arith.constant 0 : index
    %59 = vector.load %arg9[%c0_38, %c0_39] : memref<64x32xf32, #tpu.memory_space<vmem>>, vector<64x32xf32>
    %60 = arith.subf %58, %59 : vector<64x32xf32>
    %cst_40 = arith.constant 5.000000e-01 : f32
    %61 = vector.broadcast %cst_40 : f32 to vector<64x32xf32>
    %62 = arith.mulf %60, %61 : vector<64x32xf32>
    %63 = arith.addf %59, %62 : vector<64x32xf32>
    %cst_41 = arith.constant 1.000000e+00 : f32
    %64 = vector.broadcast %cst_41 : f32 to vector<64x32xf32>
    %65 = arith.cmpf oge, %63, %64 : vector<64x32xf32>
    %cst_42 = arith.constant 1.000000e+00 : f32
    %cst_43 = arith.constant 0.000000e+00 : f32
    %66 = vector.broadcast %cst_42 : f32 to vector<64x32xf32>
    %67 = vector.broadcast %cst_43 : f32 to vector<64x32xf32>
    %68 = arith.select %65, %66, %67 : vector<64x32xi1>, vector<64x32xf32>
    %69 = arith.truncf %68 : vector<64x32xf32> to vector<64x32xbf16>
    %c1 = arith.constant 1 : index
    %c0_44 = arith.constant 0 : index
    %c0_45 = arith.constant 0 : index
    %70 = vector.load %arg7[%c1, %c0_44, %c0_45] : memref<4x64x32xbf16, #tpu.memory_space<vmem>>, vector<1x64x32xbf16>
    %71 = vector.shape_cast %70 : vector<1x64x32xbf16> to vector<64x32xbf16>
    %72 = vector.shape_cast %69 : vector<64x32xbf16> to vector<1x64x32xbf16>
    tpu.vector_store %arg7[%c1, %c0_44, %c0_45], %72 {strides = array<i32>} : memref<4x64x32xbf16, #tpu.memory_space<vmem>>, vector<1x64x32xbf16>,
    %cst_46 = arith.constant 0.000000e+00 : f32
    %73 = vector.broadcast %cst_46 : f32 to vector<64x32xf32>
    %74 = arith.select %65, %73, %63 : vector<64x32xi1>, vector<64x32xf32>
    %c0_47 = arith.constant 0 : index
    %c0_48 = arith.constant 0 : index
    %75 = vector.load %arg9[%c0_47, %c0_48] : memref<64x32xf32, #tpu.memory_space<vmem>>, vector<64x32xf32>
    tpu.vector_store %arg9[%c0_47, %c0_48], %74 {strides = array<i32>} : memref<64x32xf32, #tpu.memory_space<vmem>>, vector<64x32xf32>,
    %c0_49 = arith.constant 0 : index
    %c0_50 = arith.constant 0 : index
    %76 = vector.load %arg8[%c0_49, %c0_50] : memref<64x32xf32, #tpu.memory_space<vmem>>, vector<64x32xf32>
    %c0_51 = arith.constant 0 : index
    %c0_52 = arith.constant 0 : index
    %77 = vector.load %arg9[%c0_51, %c0_52] : memref<64x32xf32, #tpu.memory_space<vmem>>, vector<64x32xf32>
    %78 = arith.subf %76, %77 : vector<64x32xf32>
    %cst_53 = arith.constant 5.000000e-01 : f32
    %79 = vector.broadcast %cst_53 : f32 to vector<64x32xf32>
    %80 = arith.mulf %78, %79 : vector<64x32xf32>
    %81 = arith.addf %77, %80 : vector<64x32xf32>
    %cst_54 = arith.constant 1.000000e+00 : f32
    %82 = vector.broadcast %cst_54 : f32 to vector<64x32xf32>
    %83 = arith.cmpf oge, %81, %82 : vector<64x32xf32>
    %cst_55 = arith.constant 1.000000e+00 : f32
    %cst_56 = arith.constant 0.000000e+00 : f32
    %84 = vector.broadcast %cst_55 : f32 to vector<64x32xf32>
    %85 = vector.broadcast %cst_56 : f32 to vector<64x32xf32>
    %86 = arith.select %83, %84, %85 : vector<64x32xi1>, vector<64x32xf32>
    %87 = arith.truncf %86 : vector<64x32xf32> to vector<64x32xbf16>
    %c2 = arith.constant 2 : index
    %c0_57 = arith.constant 0 : index
    %c0_58 = arith.constant 0 : index
    %88 = vector.load %arg7[%c2, %c0_57, %c0_58] : memref<4x64x32xbf16, #tpu.memory_space<vmem>>, vector<1x64x32xbf16>
    %89 = vector.shape_cast %88 : vector<1x64x32xbf16> to vector<64x32xbf16>
    %90 = vector.shape_cast %87 : vector<64x32xbf16> to vector<1x64x32xbf16>
    tpu.vector_store %arg7[%c2, %c0_57, %c0_58], %90 {strides = array<i32>} : memref<4x64x32xbf16, #tpu.memory_space<vmem>>, vector<1x64x32xbf16>,
    %cst_59 = arith.constant 0.000000e+00 : f32
    %91 = vector.broadcast %cst_59 : f32 to vector<64x32xf32>
    %92 = arith.select %83, %91, %81 : vector<64x32xi1>, vector<64x32xf32>
    %c0_60 = arith.constant 0 : index
    %c0_61 = arith.constant 0 : index
    %93 = vector.load %arg9[%c0_60, %c0_61] : memref<64x32xf32, #tpu.memory_space<vmem>>, vector<64x32xf32>
    tpu.vector_store %arg9[%c0_60, %c0_61], %92 {strides = array<i32>} : memref<64x32xf32, #tpu.memory_space<vmem>>, vector<64x32xf32>,
    %c0_62 = arith.constant 0 : index
    %c0_63 = arith.constant 0 : index
    %94 = vector.load %arg8[%c0_62, %c0_63] : memref<64x32xf32, #tpu.memory_space<vmem>>, vector<64x32xf32>
    %c0_64 = arith.constant 0 : index
    %c0_65 = arith.constant 0 : index
    %95 = vector.load %arg9[%c0_64, %c0_65] : memref<64x32xf32, #tpu.memory_space<vmem>>, vector<64x32xf32>
    %96 = arith.subf %94, %95 : vector<64x32xf32>
    %cst_66 = arith.constant 5.000000e-01 : f32
    %97 = vector.broadcast %cst_66 : f32 to vector<64x32xf32>
    %98 = arith.mulf %96, %97 : vector<64x32xf32>
    %99 = arith.addf %95, %98 : vector<64x32xf32>
    %cst_67 = arith.constant 1.000000e+00 : f32
    %100 = vector.broadcast %cst_67 : f32 to vector<64x32xf32>
    %101 = arith.cmpf oge, %99, %100 : vector<64x32xf32>
    %cst_68 = arith.constant 1.000000e+00 : f32
    %cst_69 = arith.constant 0.000000e+00 : f32
    %102 = vector.broadcast %cst_68 : f32 to vector<64x32xf32>
    %103 = vector.broadcast %cst_69 : f32 to vector<64x32xf32>
    %104 = arith.select %101, %102, %103 : vector<64x32xi1>, vector<64x32xf32>
    %105 = arith.truncf %104 : vector<64x32xf32> to vector<64x32xbf16>
    %c3 = arith.constant 3 : index
    %c0_70 = arith.constant 0 : index
    %c0_71 = arith.constant 0 : index
    %106 = vector.load %arg7[%c3, %c0_70, %c0_71] : memref<4x64x32xbf16, #tpu.memory_space<vmem>>, vector<1x64x32xbf16>
    %107 = vector.shape_cast %106 : vector<1x64x32xbf16> to vector<64x32xbf16>
    %108 = vector.shape_cast %105 : vector<64x32xbf16> to vector<1x64x32xbf16>
    tpu.vector_store %arg7[%c3, %c0_70, %c0_71], %108 {strides = array<i32>} : memref<4x64x32xbf16, #tpu.memory_space<vmem>>, vector<1x64x32xbf16>,
    %cst_72 = arith.constant 0.000000e+00 : f32
    %109 = vector.broadcast %cst_72 : f32 to vector<64x32xf32>
    %110 = arith.select %101, %109, %99 : vector<64x32xi1>, vector<64x32xf32>
    %c0_73 = arith.constant 0 : index
    %c0_74 = arith.constant 0 : index
    %111 = vector.load %arg9[%c0_73, %c0_74] : memref<64x32xf32, #tpu.memory_space<vmem>>, vector<64x32xf32>
    tpu.vector_store %arg9[%c0_73, %c0_74], %110 {strides = array<i32>} : memref<64x32xf32, #tpu.memory_space<vmem>>, vector<64x32xf32>,
    return
  }
  func.func @transform_0(%arg0: i32) -> (i32, i32) {
    %c0_i32 = arith.constant 0 : i32
    %c0_i32_0 = arith.constant 0 : i32
    return %arg0, %c0_i32 : i32, i32
  }
  func.func @transform_1(%arg0: i32) -> (i32, i32) {
    %c0_i32 = arith.constant 0 : i32
    %c0_i32_0 = arith.constant 0 : i32
    %c0_i32_1 = arith.constant 0 : i32
    return %c0_i32, %c0_i32_0 : i32, i32
  }
  func.func @transform_2(%arg0: i32) -> (i32, i32) {
    %c0_i32 = arith.constant 0 : i32
    %c0_i32_0 = arith.constant 0 : i32
    %c0_i32_1 = arith.constant 0 : i32
    return %c0_i32, %c0_i32_0 : i32, i32
  }
  func.func @transform_3(%arg0: i32) -> (i32, i32) {
    %c0_i32 = arith.constant 0 : i32
    %c0_i32_0 = arith.constant 0 : i32
    %c0_i32_1 = arith.constant 0 : i32
    return %c0_i32, %c0_i32_0 : i32, i32
  }
  func.func @transform_4(%arg0: i32) -> (i32, i32) {
    %c0_i32 = arith.constant 0 : i32
    %c0_i32_0 = arith.constant 0 : i32
    %c0_i32_1 = arith.constant 0 : i32
    return %c0_i32, %c0_i32_0 : i32, i32
  }
  func.func @transform_5(%arg0: i32) -> (i32, i32) {
    %c0_i32 = arith.constant 0 : i32
    %c0_i32_0 = arith.constant 0 : i32
    %c0_i32_1 = arith.constant 0 : i32
    return %c0_i32, %c0_i32_0 : i32, i32
  }
  func.func @transform_6(%arg0: i32) -> (i32, i32, i32) {
    %c0_i32 = arith.constant 0 : i32
    %c0_i32_0 = arith.constant 0 : i32
    %c0_i32_1 = arith.constant 0 : i32
    return %c0_i32, %arg0, %c0_i32_0 : i32, i32, i32
  }
}

</mosaic_0001>

<bundles_post_ra>
// kernel: tpu_custom_call.1
= control target key start
LH: loop header
LB: loop body
LE: loop exit
PB: predicated region body
PF: predicated region fallthrough
CT: control target
= control target key end

     0   :  { %vm85_vm0 = vcmask 261120   ;;  %v2863_v0 = vmov 0   ;;  %v2864_v3 = vmov 0.0   ;;  %v31_v34 = vlaneseq  ;;  %s3707_s0 = inlined_call_operand.vmem [shape: s32[64,1], index: 0, kind: input, shape index: {}]   ;;  %s3708_s1 = inlined_call_operand.vmem [shape: f32[32,32], index: 1, kind: input, shape index: {}]   ;;  %s3709_s2 = inlined_call_operand.vmem [shape: f32[32,32], index: 2, kind: input, shape index: {}]   ;;  %s3710_s3 = inlined_call_operand.vmem [shape: f32[1,32], index: 3, kind: input, shape index: {}]   ;;  %s3711_s4 = inlined_call_operand.vmem [shape: f32[1,32], index: 4, kind: input, shape index: {}]   ;;  %s3712_s5 = inlined_call_operand.vmem [shape: f32[1,32], index: 5, kind: input, shape index: {}]   ;;  %s3713_s6 = inlined_call_operand.vmem [shape: bf16[4,64,32], index: 6, kind: output, shape index: {}]  }
   0x1   :  { %2846 = vset.pattern.permute.xlu1 %v2863_v0  ;;  %2845 = vset.pattern.permute.xlu0 %v2863_v0  ;;  %v25_v1 = vld [vmem:[%s3707_s0 + $0x10] sm:$0xff]  ;;  %v23_v2 = vld [vmem:[%s3707_s0] sm:$0xff]  ;;  %1872 = vst.msk [vmem:[#allocation3] sm:$0xff] %vm85_vm0, %v2864_v3  ;;  %1873 = vst.msk [vmem:[#allocation3 + $0x8] sm:$0xff] %vm85_vm0, %v2864_v3  ;;  %vm1968_vm10 = vcmask 257024  }
   0x2   :  { %1874 = vst.msk [vmem:[#allocation3 + $0x10] sm:$0xff] %vm85_vm0, %v2864_v3  ;;  %1875 = vst.msk [vmem:[#allocation3 + $0x18] sm:$0xff] %vm85_vm0, %v2864_v3  ;;  %40 = vperm.xlu1 %2846, %v25_v1   ;;  %34 = vperm.xlu0 %2845, %v23_v2   ;;  %v26_v4 = vld [vmem:[%s3707_s0 + $0x18] sm:$0xff]  ;;  %v24_v5 = vld [vmem:[%s3707_s0 + $0x8] sm:$0xff]  ;;  %v32_v35 = vand.u32 127, %v31_v34 }
   0x3   :  { %1876 = vst.msk [vmem:[#allocation3 + $0x20] sm:$0xff] %vm85_vm0, %v2864_v3  ;;  %1877 = vst.msk [vmem:[#allocation3 + $0x28] sm:$0xff] %vm85_vm0, %v2864_v3  ;;  %v84_v6 = vld [vmem:[%s3708_s1 + $0x18] sm:$0xff]  ;;  %v83_v8 = vld [vmem:[%s3708_s1 + $0x10] sm:$0xff] }
   0x4   :  { %1878 = vst.msk [vmem:[#allocation3 + $0x30] sm:$0xff] %vm85_vm0, %v2864_v3  ;;  %1879 = vst.msk [vmem:[#allocation3 + $0x38] sm:$0xff] %vm85_vm0, %v2864_v3  ;;  %v2931_v7 = vand.u32 4294901760, %v84_v6  ;;  %v82_v9 = vld [vmem:[%s3708_s1 + $0x8] sm:$0xff]  ;;  %v81_v10 = vld [vmem:[%s3708_s1] sm:$0xff]  ;;  %v2942_v11 = vand.u32 4294901760, %v83_v8 }
   0x5   :  { %v2944_v12 = vand.u32 4294901760, %v82_v9  ;;  %v2946_v13 = vand.u32 4294901760, %v81_v10  ;;  %v28_v15 = vld [vmem:[%s3707_s0 + $0x28] sm:$0xff]  ;;  %v27_v16 = vld [vmem:[%s3707_s0 + $0x20] sm:$0xff]  ;;  %v30_v25 = vld [vmem:[%s3707_s0 + $0x38] sm:$0xff] }
   0x6   :  { %43 = vperm.xlu1 %2846, %v26_v4   ;;  %37 = vperm.xlu0 %2845, %v24_v5   ;;  %v2949_v14 = vsub.f32 %v84_v6, %v2931_v7  ;;  %v2958_v17 = vsub.f32 %v83_v8, %v2942_v11  ;;  %v29_v26 = vld [vmem:[%s3707_s0 + $0x30] sm:$0xff] }
   0x7   :  { %v2961_v18 = vsub.f32 %v82_v9, %v2944_v12  ;;  %v2964_v19 = vsub.f32 %v81_v10, %v2946_v13  ;;  %2603 = vmatprep.subr.mxu0 %v2931_v7 }
   0x8   :  { %v2968_v20 = vand.u32 4294901760, %v2949_v14  ;;  %2604 = vmatpush3.msra.mxu0 %v2931_v7  ;;  %v2972_v21 = vand.u32 4294901760, %v2958_v17 }
   0x9   :  { %v2975_v22 = vand.u32 4294901760, %v2961_v18  ;;  %v2978_v23 = vand.u32 4294901760, %v2964_v19  ;;  %2605 = vmatprep.subr.mxu0 %v2942_v11 }
   0xa   :  { %49 = vperm.xlu1 %2846, %v28_v15   ;;  %46 = vperm.xlu0 %2845, %v27_v16   ;;  %v287_v24 = vsub.f32 %v2949_v14, %v2968_v20  ;;  %v294_v27 = vsub.f32 %v2958_v17, %v2972_v21 }
   0xb   :  { %v301_v28 = vsub.f32 %v2961_v18, %v2975_v22  ;;  %2606 = vmatpush3.msra.mxu0 %v2942_v11  ;;  %v308_v31 = vsub.f32 %v2964_v19, %v2978_v23 }
   0xc   :  { %v288_v29 = vand.u32 4294901760, %v287_v24  ;;  %2607 = vmatprep.subr.mxu0 %v2944_v12  ;;  %v295_v30 = vand.u32 4294901760, %v294_v27 }
   0xd   :  { %2608 = vmatpush3.msra.mxu0 %v2944_v12  ;;  %v302_v32 = vand.u32 4294901760, %v301_v28  ;;  %v309_v33 = vand.u32 4294901760, %v308_v31 }
   0xe   :  { %55 = vperm.xlu1 %2846, %v30_v25   ;;  %52 = vperm.xlu0 %2845, %v29_v26  }
   0xf   :  { %2623 = vmatprep.subr.mxu1 %v288_v29  ;;  %2609 = vmatprep.subr.mxu0 %v2946_v13 }
  0x10   :  { %2624 = vmatpush3.msra.mxu1 %v288_v29  ;;  %2610 = vmatpush3.msra.mxu0 %v2946_v13 }
  0x11   :  { %2625 = vmatprep.subr.mxu1 %v295_v30  ;;  %2643 = vmatprep.subr.mxu0 %v2949_v14 }
  0x12   :  { %2626 = vmatpush3.msra.mxu1 %v295_v30 }
  0x13   :  { %2627 = vmatprep.subr.mxu1 %v302_v32 }
  0x14   :  { %2628 = vmatpush3.msra.mxu1 %v302_v32 }
  0x15   :  { %2629 = vmatprep.subr.mxu1 %v309_v33 }
  0x16   :  { %2630 = vmatpush3.msra.mxu1 %v309_v33 }
  0x17   :  { %2663 = vmatprep.subr.mxu1 %v2931_v7 }
  0x7d   :  { %v41_v36 = vpop.permute.xlu1 %40  ;;  %v35_v37 = vpop.permute.xlu0 %34 }
  0x7e   :  { %vm59_vm1 = vcmp.eq.s32.totalorder %v32_v35, %v41_v36  ;;  %vm57_vm2 = vcmp.eq.s32.totalorder %v32_v35, %v35_v37 }
  0x7f   :  { %v3003_v38 = vsel %vm59_vm1, 1.0, %v2864_v3  ;;  %v3006_v39 = vsel %vm57_vm2, 1.0, %v2864_v3 }
  0x80   :  { %v93_v40 = vsel %vm85_vm0, %v3003_v38, 0  ;;  %2631 = vmatprep.mubr.msk.f32.mxu1 %vm85_vm0, %v3006_v39  ;;  %v87_v41 = vsel %vm85_vm0, %v3006_v39, 0 }
  0x81   :  { %v3014_v42 = vsub.f32 %v93_v40, %v93_v40  ;;  %v44_v43 = vpop.permute.xlu1 %43  ;;  %v38_v44 = vpop.permute.xlu0 %37  ;;  %v3016_v45 = vsub.f32 %v87_v41, %v87_v41 }
  0x82   :  { %vm60_vm3 = vcmp.eq.s32.totalorder %v32_v35, %v44_v43  ;;  %vm58_vm4 = vcmp.eq.s32.totalorder %v32_v35, %v38_v44 }
  0x83   :  { %v3019_v46 = vsel %vm60_vm3, 1.0, %v2864_v3  ;;  %v3022_v47 = vsel %vm58_vm4, 1.0, %v2864_v3  ;;  %v181_v48 = vand.u32 4294901760, %v3016_v45  ;;  %v201_v51 = vand.u32 4294901760, %v3014_v42 }
  0x84   :  { %v96_v49 = vsel %vm85_vm0, %v3019_v46, 0  ;;  %v90_v50 = vsel %vm85_vm0, %v3022_v47, 0  ;;  %2632 = vmatmul.mubr.msk.f32.vlgmr.msra.gmra.mxu1 %vm85_vm0, %v3022_v47 }
  0x85   :  { %v3032_v52 = vsub.f32 %v96_v49, %v96_v49  ;;  %v3034_v53 = vsub.f32 %v90_v50, %v90_v50  ;;  %v50_v54 = vpop.permute.xlu1 %49  ;;  %2634 = vmatprep.mubr.msk.f32.mxu1 %vm85_vm0, %v3003_v38  ;;  %v47_v55 = vpop.permute.xlu0 %46  ;;  %v182_v56 = vsub.f32 %v3016_v45, %v181_v48  ;;  %2664 = vmatpush3.msra.mxu1 %v2931_v7 }
  0x86   :  { %vm62_vm5 = vcmp.eq.s32.totalorder %v32_v35, %v50_v54  ;;  %vm61_vm6 = vcmp.eq.s32.totalorder %v32_v35, %v47_v55  ;;  %2665 = vmatprep.subr.mxu1 %v2942_v11  ;;  %v202_v63 = vsub.f32 %v3014_v42, %v201_v51 }
  0x87   :  { %v3044_v57 = vsel %vm62_vm5, 1.0, %v2864_v3  ;;  %v3047_v58 = vsel %vm61_vm6, 1.0, %v2864_v3  ;;  %v183_v59 = vand.u32 4294901760, %v182_v56  ;;  %v191_v60 = vand.u32 4294901760, %v3034_v53  ;;  %2666 = vmatpush3.msra.mxu1 %v2942_v11 }
  0x88   :  { %v102_v61 = vsel %vm85_vm0, %v3044_v57, 0  ;;  %v99_v62 = vsel %vm85_vm0, %v3047_v58, 0  ;;  %2635 = vmatmul.mubr.msk.f32.gmra.mxu1 %vm85_vm0, %v3019_v46  ;;  %2667 = vmatprep.subr.mxu1 %v2944_v12  ;;  %v211_v0 = vand.u32 4294901760, %v3032_v52  ;;  %v203_v26 = vand.u32 4294901760, %v202_v63 }
  0x89   :  { %v3062_v1 = vsub.f32 %v102_v61, %v102_v61  ;;  %v3064_v2 = vsub.f32 %v99_v62, %v99_v62  ;;  %v56_v4 = vpop.permute.xlu1 %55  ;;  %2611 = vmatprep.mubr.f32.mxu0 %v183_v59  ;;  %2637 = vmatprep.mubr.msk.f32.mxu1 %vm85_vm0, %v3047_v58  ;;  %v53_v5 = vpop.permute.xlu0 %52  ;;  %v192_v6 = vsub.f32 %v3034_v53, %v191_v60 }
  0x8a   :  { %vm64_vm7 = vcmp.eq.s32.totalorder %v32_v35, %v56_v4  ;;  %vm63_vm8 = vcmp.eq.s32.totalorder %v32_v35, %v53_v5  ;;  %v212_v8 = vsub.f32 %v3032_v52, %v211_v0  ;;  %2668 = vmatpush3.msra.mxu1 %v2944_v12 }
  0x8b   :  { %v3072_v9 = vsel %vm64_vm7, 1.0, %v2864_v3  ;;  %v3075_v10 = vsel %vm63_vm8, 1.0, %v2864_v3  ;;  %v193_v15 = vand.u32 4294901760, %v192_v6  ;;  %v221_v16 = vand.u32 4294901760, %v3064_v2  ;;  %2669 = vmatprep.subr.mxu1 %v2946_v13 }
  0x8c   :  { %v108_v24 = vsel %vm85_vm0, %v3072_v9, 0  ;;  %v105_v25 = vsel %vm85_vm0, %v3075_v10, 0  ;;  %2638 = vmatmul.mubr.msk.f32.gmra.mxu1 %vm85_vm0, %v3044_v57  ;;  %v231_v27 = vand.u32 4294901760, %v3062_v1  ;;  %v213_v31 = vand.u32 4294901760, %v212_v8 }
  0x8d   :  { %v3086_v28 = vsub.f32 %v108_v24, %v108_v24  ;;  %v240_v29 = vsub.f32 %v105_v25, %v105_v25  ;;  %2612 = vmatmul.mubr.f32.vlgmr.msra.gmra.mxu0 %v193_v15  ;;  %2640 = vmatprep.mubr.msk.f32.mxu1 %vm85_vm0, %v3075_v10  ;;  %v222_v30 = vsub.f32 %v3064_v2, %v221_v16 }
  0x8e   :  { %2644 = vmatpush3.msra.mxu0 %v2949_v14  ;;  %2614 = vmatprep.mubr.f32.mxu0 %v203_v26  ;;  %v232_v33 = vsub.f32 %v3062_v1, %v231_v27 }
  0x8f   :  { %2645 = vmatprep.subr.mxu0 %v2958_v17  ;;  %v223_v32 = vand.u32 4294901760, %v222_v30  ;;  %2670 = vmatpush3.msra.mxu1 %v2946_v13  ;;  %v241_v34 = vand.u32 4294901760, %v240_v29  ;;  %v251_v35 = vand.u32 4294901760, %v3086_v28 }
  0x90   :  { %2641 = vmatmul.mubr.msk.f32.gmra.mxu1 %vm85_vm0, %v3072_v9  ;;  %2646 = vmatpush3.msra.mxu0 %v2958_v17  ;;  %v233_v36 = vand.u32 4294901760, %v232_v33 }
  0x91   :  { %2615 = vmatmul.mubr.f32.gmra.mxu0 %v213_v31  ;;  %2671 = vmatprep.mubr.f32.mxu1 %v181_v48  ;;  %v242_v14 = vsub.f32 %v240_v29, %v241_v34  ;;  %v252_v40 = vsub.f32 %v3086_v28, %v251_v35 }
  0x92   :  { %2617 = vmatprep.mubr.f32.mxu0 %v223_v32  ;;  %2647 = vmatprep.subr.mxu0 %v2961_v18 }
  0x93   :  { %2648 = vmatpush3.msra.mxu0 %v2961_v18  ;;  %v243_v37 = vand.u32 4294901760, %v242_v14  ;;  %2703 = vmatprep.subr.mxu1 %v2931_v7  ;;  %v253_v17 = vand.u32 4294901760, %v252_v40  ;;  %v898_v18 = vld [vmem:[%s3709_s2 + $0x10] sm:$0xff] }
  0x94   :  { %2672 = vmatmul.mubr.f32.vlgmr.msra.gmra.mxu1 %v191_v60  ;;  %2649 = vmatprep.subr.mxu0 %v2964_v19 }
  0x95   :  { %2618 = vmatmul.mubr.f32.gmra.mxu0 %v233_v36  ;;  %2674 = vmatprep.mubr.f32.mxu1 %v201_v51 }
  0x96   :  { %2620 = vmatprep.mubr.f32.mxu0 %v243_v37  ;;  %2650 = vmatpush3.msra.mxu0 %v2964_v19  ;;  %v938_v19 = vsel %vm85_vm0, %v898_v18, 0 }
  0x97   :  { %2683 = vmatprep.subr.mxu0 %v2968_v20  ;;  %2704 = vmatpush3.msra.mxu1 %v2931_v7  ;;  %v899_v7 = vld [vmem:[%s3709_s2 + $0x18] sm:$0xff] }
  0x98   :  { %2675 = vmatmul.mubr.f32.gmra.mxu1 %v211_v0  ;;  %2705 = vmatprep.subr.mxu1 %v2942_v11 }
  0x99   :  { %2621 = vmatmul.mubr.f32.gmra.mxu0 %v253_v17  ;;  %2677 = vmatprep.mubr.f32.mxu1 %v221_v16 }
  0x9a   :  { %2651 = vmatprep.mubr.f32.mxu0 %v3016_v45  ;;  %2706 = vmatpush3.msra.mxu1 %v2942_v11  ;;  %v941_v11 = vsel %vm85_vm0, %v899_v7, 0 }
  0x9b   :  { %2707 = vmatprep.subr.mxu1 %v2944_v12 }
  0x9c   :  { %2678 = vmatmul.mubr.f32.gmra.mxu1 %v231_v27 }
  0x9d   :  { %2652 = vmatmul.mubr.f32.vlgmr.msra.gmra.mxu0 %v3034_v53  ;;  %2680 = vmatprep.mubr.f32.mxu1 %v241_v34 }
  0x9e   :  { %2684 = vmatpush3.msra.mxu0 %v2968_v20  ;;  %2654 = vmatprep.mubr.f32.mxu0 %v3014_v42 }
  0x9f   :  { %2685 = vmatprep.subr.mxu0 %v2972_v21  ;;  %2708 = vmatpush3.msra.mxu1 %v2944_v12  ;;  %v3167_v12 = vand.u32 4294901760, %v941_v11 }
  0xa0   :  { %2681 = vmatmul.mubr.f32.gmra.mxu1 %v251_v35  ;;  %2686 = vmatpush3.msra.mxu0 %v2972_v21  ;;  %v3181_v21 = vand.u32 4294901760, %v938_v19 }
  0xa1   :  { %2655 = vmatmul.mubr.f32.gmra.mxu0 %v3032_v52  ;;  %2711 = vmatprep.mubr.msk.f32.mxu1 %vm85_vm0, %v3006_v39 }
  0xa2   :  { %2657 = vmatprep.mubr.f32.mxu0 %v3064_v2  ;;  %2709 = vmatprep.subr.mxu1 %v2946_v13 }
  0xa3   :  { %2710 = vmatpush3.msra.mxu1 %v2946_v13  ;;  %2687 = vmatprep.subr.mxu0 %v2975_v22  ;;  %v3170_v13 = vsub.f32 %v941_v11, %v3167_v12 }
  0xa4   :  { %2712 = vmatmul.mubr.msk.f32.vlgmr.msra.gmra.mxu1 %vm85_vm0, %v3022_v47  ;;  %2688 = vmatpush3.msra.mxu0 %v2975_v22 }
  0xa5   :  { %2658 = vmatmul.mubr.f32.gmra.mxu0 %v3062_v1  ;;  %2714 = vmatprep.mubr.msk.f32.mxu1 %vm85_vm0, %v3003_v38  ;;  %v3179_v20 = vand.u32 4294901760, %v3170_v13 }
  0xa6   :  { %2660 = vmatprep.mubr.f32.mxu0 %v240_v29  ;;  %2689 = vmatprep.subr.mxu0 %v2978_v23 }
  0xa7   :  { %2690 = vmatpush3.msra.mxu0 %v2978_v23  ;;  %v1120_v22 = vsub.f32 %v3170_v13, %v3179_v20  ;;  %v3186_v23 = vsub.f32 %v938_v19, %v3181_v21 }
  0xa8   :  { %2715 = vmatmul.mubr.msk.f32.gmra.mxu1 %vm85_vm0, %v3019_v46  ;;  %2723 = vmatprep.subr.mxu0 %v3167_v12 }
  0xa9   :  { %2661 = vmatmul.mubr.f32.gmra.mxu0 %v3086_v28  ;;  %2717 = vmatprep.mubr.msk.f32.mxu1 %vm85_vm0, %v3047_v58  ;;  %v1121_v41 = vand.u32 4294901760, %v1120_v22  ;;  %v3195_v42 = vand.u32 4294901760, %v3186_v23 }
  0xaa   :  { %2691 = vmatprep.mubr.msk.f32.mxu0 %vm85_vm0, %v3006_v39 }
  0xab   :  { %2743 = vmatprep.subr.mxu1 %v1121_v41  ;;  %v1127_v44 = vsub.f32 %v3186_v23, %v3195_v42 }
  0xac   :  { %2718 = vmatmul.mubr.msk.f32.gmra.mxu1 %vm85_vm0, %v3044_v57 }
  0xad   :  { %2692 = vmatmul.mubr.msk.f32.vlgmr.msra.gmra.mxu0 %vm85_vm0, %v3022_v47  ;;  %2720 = vmatprep.mubr.msk.f32.mxu1 %vm85_vm0, %v3075_v10  ;;  %v1128_v48 = vand.u32 4294901760, %v1127_v44 }
  0xae   :  { %2694 = vmatprep.mubr.msk.f32.mxu0 %vm85_vm0, %v3003_v38  ;;  %2724 = vmatpush3.xpose.msra.mxu0 %v3167_v12  ;;  %v897_v38 = vld [vmem:[%s3709_s2 + $0x8] sm:$0xff] }
  0xaf   :  { %2725 = vmatprep.subr.mxu0 %v3181_v21  ;;  %v935_v39 = vsel %vm85_vm0, %v897_v38, 0  ;;  %2744 = vmatpush3.xpose.msra.mxu1 %v1121_v41 }
  0xb0   :  { %2721 = vmatmul.mubr.msk.f32.gmra.mxu1 %vm85_vm0, %v3072_v9  ;;  %v3197_v43 = vand.u32 4294901760, %v935_v39  ;;  %2745 = vmatprep.subr.mxu1 %v1128_v48 }
  0xb1   :  { %2695 = vmatmul.mubr.msk.f32.gmra.mxu0 %vm85_vm0, %v3019_v46  ;;  %v896_v46 = vld [vmem:[%s3709_s2] sm:$0xff] }
  0xb2   :  { %2697 = vmatprep.mubr.msk.f32.mxu0 %vm85_vm0, %v3047_v58  ;;  %2726 = vmatpush3.xpose.msra.mxu0 %v3181_v21  ;;  %v3202_v45 = vsub.f32 %v935_v39, %v3197_v43  ;;  %v932_v47 = vsel %vm85_vm0, %v896_v46, 0 }
  0xb3   :  { %2727 = vmatprep.subr.mxu0 %v3197_v43  ;;  %v3213_v50 = vand.u32 4294901760, %v932_v47  ;;  %2746 = vmatpush3.xpose.msra.mxu1 %v1128_v48 }
  0xb4   :  { %v3211_v49 = vand.u32 4294901760, %v3202_v45 }
  0xb5   :  { %2698 = vmatmul.mubr.msk.f32.gmra.mxu0 %vm85_vm0, %v3044_v57  ;;  %v3218_v52 = vsub.f32 %v932_v47, %v3213_v50 }
  0xb6   :  { %2700 = vmatprep.mubr.msk.f32.mxu0 %vm85_vm0, %v3075_v10  ;;  %2728 = vmatpush3.xpose.msra.mxu0 %v3197_v43  ;;  %v1134_v51 = vsub.f32 %v3202_v45, %v3211_v49 }
  0xb7   :  { %2729 = vmatprep.subr.mxu0 %v3213_v50  ;;  %v3223_v54 = vand.u32 4294901760, %v3218_v52 }
  0xb8   :  { %v1135_v53 = vand.u32 4294901760, %v1134_v51 }
  0xb9   :  { %2701 = vmatmul.mubr.msk.f32.gmra.mxu0 %vm85_vm0, %v3072_v9  ;;  %v1141_v55 = vsub.f32 %v3218_v52, %v3223_v54 }
  0xba   :  { %2730 = vmatpush3.xpose.msra.mxu0 %v3213_v50  ;;  %2747 = vmatprep.subr.mxu1 %v1135_v53 }
  0xbb   :  { %2763 = vmatprep.subr.mxu0 %v3170_v13  ;;  %2748 = vmatpush3.xpose.msra.mxu1 %v1135_v53  ;;  %v1142_v56 = vand.u32 4294901760, %v1141_v55 }
  0xbd   :  { %2749 = vmatprep.subr.mxu1 %v1142_v56 }
  0xbf   :  { %2750 = vmatpush3.xpose.msra.mxu1 %v1142_v56 }
  0xc0   :  { %2783 = vmatprep.subr.mxu1 %v3167_v12 }
 0x144   :  { %v2633_v57 = vpop.f32.mrf.mxu1 }
 0x146   :  { %v346_v58 = vpop.f32.mrf.mxu1 }
 0x148   :  { %v2636_v59 = vpop.f32.mrf.mxu1 }
 0x14a   :  { %v358_v60 = vpop.f32.mrf.mxu1 }
 0x14c   :  { %v2639_v61 = vpop.f32.mrf.mxu1 }
 0x14d   :  { %v2613_v62 = vpop.f32.mrf.mxu0 }
 0x14e   :  { %v370_v63 = vpop.f32.mrf.mxu1  ;;  %v353_v14 = vadd.f32 %v2633_v57, %v2613_v62 }
 0x14f   :  { %v185_v0 = vpop.f32.mrf.mxu0 }
 0x150   :  { %v2642_v1 = vpop.f32.mrf.mxu1  ;;  %v347_v40 = vadd.f32 %v346_v58, %v185_v0 }
 0x151   :  { %v2616_v2 = vpop.f32.mrf.mxu0 }
 0x152   :  { %v382_v4 = vpop.f32.mrf.mxu1  ;;  %v365_v18 = vadd.f32 %v2636_v59, %v2616_v2 }
 0x153   :  { %v205_v5 = vpop.f32.mrf.mxu0 }
 0x154   :  { %v2673_v6 = vpop.f32.mrf.mxu1  ;;  %v359_v22 = vadd.f32 %v358_v60, %v205_v5 }
 0x155   :  { %v2619_v8 = vpop.f32.mrf.mxu0 }
 0x156   :  { %v594_v9 = vpop.f32.mrf.mxu1  ;;  %v377_v44 = vadd.f32 %v2639_v61, %v2619_v8 }
 0x157   :  { %v225_v10 = vpop.f32.mrf.mxu0 }
 0x158   :  { %v2676_v15 = vpop.f32.mrf.mxu1  ;;  %v371_v57 = vadd.f32 %v370_v63, %v225_v10 }
 0x159   :  { %v2622_v16 = vpop.f32.mrf.mxu0 }
 0x15a   :  { %v610_v24 = vpop.f32.mrf.mxu1 }
 0x15b   :  { %v245_v25 = vpop.f32.mrf.mxu0 }
 0x15c   :  { %v2679_v26 = vpop.f32.mrf.mxu1  ;;  %v383_v8 = vadd.f32 %v382_v4, %v245_v25 }
 0x15d   :  { %v2653_v27 = vpop.f32.mrf.mxu0 }
 0x15e   :  { %v626_v28 = vpop.f32.mrf.mxu1  ;;  %v476_v17 = vadd.f32 %v2653_v27, %v353_v14  ;;  %v389_v27 = vadd.f32 %v2642_v1, %v2622_v16 }
 0x15f   :  { %v468_v29 = vpop.f32.mrf.mxu0 }
 0x160   :  { %v3229_v30 = vpop.f32.mrf.mxu1  ;;  %v469_v19 = vadd.f32 %v468_v29, %v347_v40  ;;  %v603_v41 = vadd.f32 %v2673_v6, %v476_v17 }
 0x161   :  { %v2656_v31 = vpop.f32.mrf.mxu0 }
 0x162   :  { %v3231_v32 = vpop.f32.mrf.mxu1  ;;  %v490_v39 = vadd.f32 %v2656_v31, %v365_v18  ;;  %v595_v53 = vadd.f32 %v594_v9, %v469_v19 }
 0x163   :  { %v482_v33 = vpop.f32.mrf.mxu0 }
 0x164   :  { %v2713_v34 = vpop.f32.mrf.mxu1  ;;  %v483_v46 = vadd.f32 %v482_v33, %v359_v22  ;;  %v619_v0 = vadd.f32 %v2676_v15, %v490_v39 }
 0x165   :  { %v2659_v35 = vpop.f32.mrf.mxu0 }
 0x166   :  { %v850_v36 = vpop.f32.mrf.mxu1  ;;  %v504_v55 = vadd.f32 %v2659_v35, %v377_v44  ;;  %v611_v2 = vadd.f32 %v610_v24, %v483_v46 }
 0x167   :  { %v496_v37 = vpop.f32.mrf.mxu0 }
 0x168   :  { %v2716_v7 = vpop.f32.mrf.mxu1  ;;  %v497_v60 = vadd.f32 %v496_v37, %v371_v57  ;;  %v635_v9 = vadd.f32 %v2679_v26, %v504_v55 }
 0x169   :  { %v2662_v11 = vpop.f32.mrf.mxu0 }
 0x16a   :  { %v862_v47 = vpop.f32.mrf.mxu1  ;;  %v518_v33 = vadd.f32 %v2662_v11, %v389_v27  ;;  %v627_v37 = vadd.f32 %v626_v28, %v497_v60 }
 0x16b   :  { %v510_v38 = vpop.f32.mrf.mxu0 }
 0x16c   :  { %v2719_v14 = vpop.f32.mrf.mxu1  ;;  %v511_v15 = vadd.f32 %v510_v38, %v383_v8  ;;  %v651_v22 = vadd.f32 %v3229_v30, %v518_v33 }
 0x16d   :  { %v2693_v48 = vpop.f32.mrf.mxu0 }
 0x16e   :  { %v740_v51 = vadd.f32 %v2693_v48, %v603_v41  ;;  %v874_v16 = vpop.f32.mrf.mxu1  ;;  %v643_v44 = vadd.f32 %v3231_v32, %v511_v15 }
 0x16f   :  { %v733_v56 = vpop.f32.mrf.mxu0 }
 0x170   :  { %v857_v62 = vadd.f32 %v2713_v34, %v740_v51  ;;  %v734_v58 = vadd.f32 %v733_v56, %v595_v53  ;;  %v2722_v38 = vpop.f32.mrf.mxu1 }
 0x171   :  { %v2696_v59 = vpop.f32.mrf.mxu0 }
 0x172   :  { %v911_v5 = vsel %vm85_vm0, %v857_v62, 0  ;;  %v851_v6 = vadd.f32 %v850_v36, %v734_v58  ;;  %v752_v61 = vadd.f32 %v2696_v59, %v619_v0  ;;  %v886_v27 = vpop.f32.mrf.mxu1 }
 0x173   :  { %v3234_v29 = vand.u32 4294901760, %v911_v5  ;;  %v745_v31 = vpop.f32.mrf.mxu0 }
 0x174   :  { %v908_v63 = vsel %vm85_vm0, %v851_v6, 0  ;;  %v869_v10 = vadd.f32 %v2716_v7, %v752_v61  ;;  %v746_v34 = vadd.f32 %v745_v31, %v611_v2 }
 0x175   :  { %v3238_v1 = vsub.f32 %v911_v5, %v3234_v29  ;;  %v3240_v24 = vand.u32 4294901760, %v908_v63  ;;  %v2699_v35 = vpop.f32.mrf.mxu0 }
 0x176   :  { %v917_v36 = vsel %vm85_vm0, %v869_v10, 0  ;;  %v863_v4 = vadd.f32 %v862_v47, %v746_v34  ;;  %v764_v25 = vadd.f32 %v2699_v35, %v635_v9 }
 0x177   :  { %v1024_v26 = vand.u32 4294901760, %v3238_v1  ;;  %v3245_v40 = vsub.f32 %v908_v63, %v3240_v24  ;;  %v3247_v17 = vand.u32 4294901760, %v917_v36  ;;  %v757_v7 = vpop.f32.mrf.mxu0  ;;  %2751 = vmatprep.mubr.f32.mxu1 %v3240_v24 }
 0x178   :  { %v914_v11 = vsel %vm85_vm0, %v863_v4, 0  ;;  %v881_v18 = vadd.f32 %v2719_v14, %v764_v25  ;;  %v758_v19 = vadd.f32 %v757_v7, %v627_v37  ;;  %2752 = vmatmul.mubr.f32.vlgmr.msra.gmra.mxu1 %v3234_v29 }
 0x179   :  { %v3254_v28 = vsub.f32 %v917_v36, %v3247_v17  ;;  %v3256_v39 = vand.u32 4294901760, %v914_v11  ;;  %v2702_v41 = vpop.f32.mrf.mxu0  ;;  %2784 = vmatpush3.xpose.msra.mxu1 %v3167_v12  ;;  %v1014_v46 = vand.u32 4294901760, %v3245_v40  ;;  %v1025_v47 = vsub.f32 %v3238_v1, %v1024_v26 }
 0x17a   :  { %v923_v48 = vsel %vm85_vm0, %v881_v18, 0  ;;  %v875_v30 = vadd.f32 %v874_v16, %v758_v19  ;;  %v776_v51 = vadd.f32 %v2702_v41, %v651_v22  ;;  %2785 = vmatprep.subr.mxu1 %v3181_v21 }
 0x17b   :  { %v3267_v53 = vsub.f32 %v914_v11, %v3256_v39  ;;  %v3269_v55 = vand.u32 4294901760, %v923_v48  ;;  %v769_v56 = vpop.f32.mrf.mxu0  ;;  %2754 = vmatprep.mubr.f32.mxu1 %v3256_v39  ;;  %v1015_v32 = vsub.f32 %v3245_v40, %v1014_v46  ;;  %v1044_v0 = vand.u32 4294901760, %v3254_v28 }
 0x17c   :  { %v920_v57 = vsel %vm85_vm0, %v875_v30, 0  ;;  %v893_v62 = vadd.f32 %v2722_v38, %v776_v51  ;;  %v770_v58 = vadd.f32 %v769_v56, %v643_v44  ;;  %2755 = vmatmul.mubr.f32.gmra.mxu1 %v3247_v17  ;;  %v1026_v5 = vand.u32 4294901760, %v1025_v47 }
 0x17d   :  { %v3277_v14 = vsub.f32 %v923_v48, %v3269_v55  ;;  %v3279_v59 = vand.u32 4294901760, %v920_v57  ;;  %2786 = vmatpush3.xpose.msra.mxu1 %v3181_v21  ;;  %v1016_v2 = vand.u32 4294901760, %v1015_v32  ;;  %v1034_v60 = vand.u32 4294901760, %v3267_v53  ;;  %v2368_v48 = vld [vmem:[%s3710_s3] ss:$0 sm:$0xff] }
 0x17e   :  { %v929_v6 = vsel %vm85_vm0, %v893_v62, 0  ;;  %v887_v61 = vadd.f32 %v886_v27, %v770_v58  ;;  %2787 = vmatprep.subr.mxu1 %v3197_v43  ;;  %v1045_v8 = vsub.f32 %v3254_v28, %v1044_v0 }
 0x17f   :  { %v3287_v31 = vsub.f32 %v920_v57, %v3279_v59  ;;  %v3289_v9 = vand.u32 4294901760, %v929_v6  ;;  %2731 = vmatprep.mubr.f32.mxu0 %v1016_v2  ;;  %2757 = vmatprep.mubr.f32.mxu1 %v3279_v59  ;;  %v1035_v33 = vsub.f32 %v3267_v53, %v1034_v60  ;;  %v1064_v63 = vand.u32 4294901760, %v3277_v14 }
 0x180   :  { %v926_v10 = vsel %vm85_vm0, %v887_v61, 0  ;;  %2732 = vmatmul.mubr.f32.vlgmr.msra.gmra.mxu0 %v1026_v5  ;;  %2758 = vmatmul.mubr.f32.gmra.mxu1 %v3269_v55  ;;  %v1046_v36 = vand.u32 4294901760, %v1045_v8 }
 0x181   :  { %v3297_v34 = vsub.f32 %v929_v6, %v3289_v9  ;;  %v3299_v15 = vand.u32 4294901760, %v926_v10  ;;  %2764 = vmatpush3.xpose.msra.mxu0 %v3170_v13  ;;  %2788 = vmatpush3.xpose.msra.mxu1 %v3197_v43  ;;  %v1036_v16 = vand.u32 4294901760, %v1035_v33  ;;  %v1054_v35 = vand.u32 4294901760, %v3287_v31 }
 0x182   :  { %2765 = vmatprep.subr.mxu0 %v3186_v23  ;;  %2789 = vmatprep.subr.mxu1 %v3213_v50  ;;  %v1065_v4 = vsub.f32 %v3277_v14, %v1064_v63 }
 0x183   :  { %v1073_v25 = vsub.f32 %v926_v10, %v3299_v15  ;;  %2734 = vmatprep.mubr.f32.mxu0 %v1036_v16  ;;  %2760 = vmatprep.mubr.f32.mxu1 %v3299_v15  ;;  %v1055_v37 = vsub.f32 %v3287_v31, %v1054_v35  ;;  %v1084_v13 = vand.u32 4294901760, %v3297_v34 }
 0x184   :  { %2735 = vmatmul.mubr.f32.gmra.mxu0 %v1046_v36  ;;  %2761 = vmatmul.mubr.f32.gmra.mxu1 %v3289_v9  ;;  %v1066_v18 = vand.u32 4294901760, %v1065_v4 }
 0x185   :  { %2766 = vmatpush3.xpose.msra.mxu0 %v3186_v23  ;;  %2790 = vmatpush3.xpose.msra.mxu1 %v3213_v50  ;;  %v1056_v7 = vand.u32 4294901760, %v1055_v37  ;;  %v1074_v11 = vand.u32 4294901760, %v1073_v25  ;;  %v1085_v19 = vsub.f32 %v3297_v34, %v1084_v13 }
 0x186   :  { %2791 = vmatprep.mubr.f32.mxu1 %v1014_v46  ;;  %2767 = vmatprep.subr.mxu0 %v3202_v45 }
 0x187   :  { %2737 = vmatprep.mubr.f32.mxu0 %v1056_v7  ;;  %2823 = vmatprep.subr.mxu1 %v3167_v12  ;;  %v1075_v22 = vsub.f32 %v1073_v25, %v1074_v11  ;;  %v1086_v38 = vand.u32 4294901760, %v1085_v19 }
 0x188   :  { %2738 = vmatmul.mubr.f32.gmra.mxu0 %v1066_v18  ;;  %2792 = vmatmul.mubr.f32.vlgmr.msra.gmra.mxu1 %v1024_v26 }
 0x189   :  { %2768 = vmatpush3.xpose.msra.mxu0 %v3202_v45  ;;  %2794 = vmatprep.mubr.f32.mxu1 %v1034_v60  ;;  %v1076_v23 = vand.u32 4294901760, %v1075_v22 }
 0x18a   :  { %2824 = vmatpush3.xpose.msra.mxu1 %v3167_v12  ;;  %2769 = vmatprep.subr.mxu0 %v3218_v52 }
 0x18b   :  { %2740 = vmatprep.mubr.f32.mxu0 %v1076_v23  ;;  %2825 = vmatprep.subr.mxu1 %v3181_v21 }
 0x18c   :  { %2741 = vmatmul.mubr.f32.gmra.mxu0 %v1086_v38  ;;  %2795 = vmatmul.mubr.f32.gmra.mxu1 %v1044_v0 }
 0x18d   :  { %2770 = vmatpush3.xpose.msra.mxu0 %v3218_v52  ;;  %2771 = vmatprep.mubr.f32.mxu0 %v3245_v40 }
 0x18e   :  { %2797 = vmatprep.mubr.f32.mxu1 %v1054_v35  ;;  %2826 = vmatpush3.xpose.msra.mxu1 %v3181_v21 }
 0x18f   :  { %2803 = vmatprep.subr.mxu0 %v3179_v20  ;;  %2827 = vmatprep.subr.mxu1 %v3197_v43 }
 0x190   :  { %2772 = vmatmul.mubr.f32.vlgmr.msra.gmra.mxu0 %v3238_v1  ;;  %2798 = vmatmul.mubr.f32.gmra.mxu1 %v1064_v63 }
 0x191   :  { %2804 = vmatpush3.xpose.msra.mxu0 %v3179_v20  ;;  %2774 = vmatprep.mubr.f32.mxu0 %v3267_v53 }
 0x192   :  { %2800 = vmatprep.mubr.f32.mxu1 %v1074_v11  ;;  %2828 = vmatpush3.xpose.msra.mxu1 %v3197_v43 }
 0x193   :  { %2805 = vmatprep.subr.mxu0 %v3195_v42  ;;  %2829 = vmatprep.subr.mxu1 %v3213_v50 }
 0x194   :  { %2775 = vmatmul.mubr.f32.gmra.mxu0 %v3254_v28  ;;  %2801 = vmatmul.mubr.f32.gmra.mxu1 %v1084_v13 }
 0x195   :  { %2806 = vmatpush3.xpose.msra.mxu0 %v3195_v42  ;;  %2777 = vmatprep.mubr.f32.mxu0 %v3287_v31 }
 0x196   :  { %2830 = vmatpush3.xpose.msra.mxu1 %v3213_v50  ;;  %2831 = vmatprep.mubr.f32.mxu1 %v3240_v24 }
 0x197   :  { %2807 = vmatprep.subr.mxu0 %v3211_v49 }
 0x198   :  { %2778 = vmatmul.mubr.f32.gmra.mxu0 %v3277_v14 }
 0x199   :  { %2808 = vmatpush3.xpose.msra.mxu0 %v3211_v49  ;;  %2832 = vmatmul.mubr.f32.vlgmr.msra.gmra.mxu1 %v3234_v29 }
 0x19a   :  { %2780 = vmatprep.mubr.f32.mxu0 %v1073_v25  ;;  %2834 = vmatprep.mubr.f32.mxu1 %v3256_v39 }
 0x19b   :  { %2809 = vmatprep.subr.mxu0 %v3223_v54 }
 0x19c   :  { %2781 = vmatmul.mubr.f32.gmra.mxu0 %v3297_v34 }
 0x19d   :  { %2810 = vmatpush3.xpose.msra.mxu0 %v3223_v54  ;;  %2835 = vmatmul.mubr.f32.gmra.mxu1 %v3247_v17 }
 0x19e   :  { %2811 = vmatprep.mubr.f32.mxu0 %v3240_v24  ;;  %2837 = vmatprep.mubr.f32.mxu1 %v3279_v59 }
 0x1a0   :  { %2812 = vmatmul.mubr.f32.vlgmr.msra.gmra.mxu0 %v3234_v29 }
 0x1a1   :  { %2838 = vmatmul.mubr.f32.gmra.mxu1 %v3269_v55  ;;  %2814 = vmatprep.mubr.f32.mxu0 %v3256_v39 }
 0x1a2   :  { %2840 = vmatprep.mubr.f32.mxu1 %v3299_v15 }
 0x1a4   :  { %2815 = vmatmul.mubr.f32.gmra.mxu0 %v3247_v17 }
 0x1a5   :  { %2841 = vmatmul.mubr.f32.gmra.mxu1 %v3289_v9  ;;  %2817 = vmatprep.mubr.f32.mxu0 %v3279_v59 }
 0x1a8   :  { %2818 = vmatmul.mubr.f32.gmra.mxu0 %v3269_v55 }
 0x1a9   :  { %2820 = vmatprep.mubr.f32.mxu0 %v3299_v15 }
 0x1ac   :  { %2821 = vmatmul.mubr.f32.gmra.mxu0 %v3289_v9 }
 0x238   :  { %v2753_v12 = vpop.f32.mrf.mxu1 }
 0x23a   :  { %v1179_v20 = vpop.f32.mrf.mxu1 }
 0x23c   :  { %v2756_v21 = vpop.f32.mrf.mxu1 }
 0x23e   :  { %v1191_v42 = vpop.f32.mrf.mxu1 }
 0x240   :  { %v2733_v43 = vpop.f32.mrf.mxu0  ;;  %v2759_v45 = vpop.f32.mrf.mxu1 }
 0x241   :  { %v1029_v56 = vadd.f32 %v2733_v43, %v2368_v48 }
 0x242   :  { %v1018_v49 = vpop.f32.mrf.mxu0  ;;  %v1203_v50 = vpop.f32.mrf.mxu1 }
 0x243   :  { %v1019_v62 = vadd.f32 %v2368_v48, %v1018_v49  ;;  %v1186_v27 = vadd.f32 %v2753_v12, %v1029_v56 }
 0x244   :  { %v2736_v52 = vpop.f32.mrf.mxu0  ;;  %v3360_v54 = vpop.f32.mrf.mxu1 }
 0x245   :  { %v1049_v0 = vadd.f32 %v2736_v52, %v2368_v48  ;;  %v1180_v5 = vadd.f32 %v1179_v20, %v1019_v62 }
 0x246   :  { %v1038_v29 = vpop.f32.mrf.mxu0  ;;  %v3362_v1 = vpop.f32.mrf.mxu1 }
 0x247   :  { %v1039_v59 = vadd.f32 %v2368_v48, %v1038_v29  ;;  %v1198_v31 = vadd.f32 %v2756_v21, %v1049_v0 }
 0x248   :  { %v2739_v24 = vpop.f32.mrf.mxu0  ;;  %v2793_v26 = vpop.f32.mrf.mxu1 }
 0x249   :  { %v1069_v33 = vadd.f32 %v2739_v24, %v2368_v48  ;;  %v1192_v10 = vadd.f32 %v1191_v42, %v1039_v59 }
 0x24a   :  { %v1058_v40 = vpop.f32.mrf.mxu0  ;;  %v1427_v17 = vpop.f32.mrf.mxu1 }
 0x24b   :  { %v1059_v63 = vadd.f32 %v2368_v48, %v1058_v40  ;;  %v1210_v7 = vadd.f32 %v2759_v45, %v1069_v33 }
 0x24c   :  { %v2742_v28 = vpop.f32.mrf.mxu0  ;;  %v2796_v39 = vpop.f32.mrf.mxu1 }
 0x24d   :  { %v1089_v13 = vadd.f32 %v2742_v28, %v2368_v48  ;;  %v1204_v11 = vadd.f32 %v1203_v50, %v1059_v63 }
 0x24e   :  { %v1078_v41 = vpop.f32.mrf.mxu0  ;;  %v1443_v44 = vpop.f32.mrf.mxu1 }
 0x24f   :  { %v1079_v19 = vadd.f32 %v2368_v48, %v1078_v41  ;;  %v1222_v24 = vadd.f32 %v3360_v54, %v1089_v13 }
 0x250   :  { %v2773_v46 = vpop.f32.mrf.mxu0  ;;  %v2799_v47 = vpop.f32.mrf.mxu1 }
 0x251   :  { %v1309_v60 = vadd.f32 %v2773_v46, %v1186_v27  ;;  %v1216_v45 = vadd.f32 %v3362_v1, %v1079_v19 }
 0x252   :  { %v1301_v30 = vpop.f32.mrf.mxu0  ;;  %v1459_v51 = vpop.f32.mrf.mxu1 }
 0x253   :  { %v1302_v8 = vadd.f32 %v1301_v30, %v1180_v5  ;;  %v1436_v16 = vadd.f32 %v2793_v26, %v1309_v60 }
 0x254   :  { %v2776_v53 = vpop.f32.mrf.mxu0  ;;  %v3367_v55 = vpop.f32.mrf.mxu1 }
 0x255   :  { %v1323_v15 = vadd.f32 %v2776_v53, %v1198_v31  ;;  %v1428_v37 = vadd.f32 %v1427_v17, %v1302_v8 }
 0x256   :  { %v1315_v32 = vpop.f32.mrf.mxu0  ;;  %v3369_v57 = vpop.f32.mrf.mxu1 }
 0x257   :  { %v1316_v35 = vadd.f32 %v1315_v32, %v1192_v10  ;;  %v1452_v23 = vadd.f32 %v2796_v39, %v1323_v15 }
 0x258   :  { %v2779_v58 = vpop.f32.mrf.mxu0 }
 0x259   :  { %v2833_v14 = vpop.f32.mrf.mxu1  ;;  %v1337_v12 = vadd.f32 %v2779_v58, %v1210_v7  ;;  %v1444_v42 = vadd.f32 %v1443_v44, %v1316_v35 }
 0x25a   :  { %v1329_v2 = vpop.f32.mrf.mxu0 }
 0x25b   :  { %v1683_v6 = vpop.f32.mrf.mxu1  ;;  %v1330_v43 = vadd.f32 %v1329_v2, %v1204_v11  ;;  %v1468_v46 = vadd.f32 %v2799_v47, %v1337_v12 }
 0x25c   :  { %v2782_v61 = vpop.f32.mrf.mxu0 }
 0x25d   :  { %v2836_v9 = vpop.f32.mrf.mxu1  ;;  %v1351_v41 = vadd.f32 %v2782_v61, %v1222_v24  ;;  %v1460_v48 = vadd.f32 %v1459_v51, %v1330_v43 }
 0x25e   :  { %v1343_v34 = vpop.f32.mrf.mxu0 }
 0x25f   :  { %v1695_v36 = vpop.f32.mrf.mxu1  ;;  %v1344_v44 = vadd.f32 %v1343_v34, %v1216_v45  ;;  %v1484_v1 = vadd.f32 %v3367_v55, %v1351_v41 }
 0x260   :  { %v2813_v4 = vpop.f32.mrf.mxu0 }
 0x261   :  { %v1573_v25 = vadd.f32 %v2813_v4, %v1436_v16  ;;  %v2839_v20 = vpop.f32.mrf.mxu1  ;;  %v1476_v0 = vadd.f32 %v3369_v57, %v1344_v44 }
 0x262   :  { %v1566_v18 = vpop.f32.mrf.mxu0 }
 0x263   :  { %v1567_v22 = vadd.f32 %v1566_v18, %v1428_v37  ;;  %v1690_v38 = vadd.f32 %v2833_v14, %v1573_v25  ;;  %v1707_v28 = vpop.f32.mrf.mxu1 }
 0x264   :  { %v2816_v21 = vpop.f32.mrf.mxu0 }
 0x265   :  { %v1585_v49 = vadd.f32 %v2816_v21, %v1452_v23  ;;  %v1732_v52 = vsel %vm85_vm0, %v1690_v38, 0.0  ;;  %v1684_v29 = vadd.f32 %v1683_v6, %v1567_v22  ;;  %v2842_v62 = vpop.f32.mrf.mxu1 }
 0x266   :  { %1733 = vadd.xlane.f32.xlu1 %v1732_v52  ;;  %v1578_v26 = vpop.f32.mrf.mxu0 }
 0x267   :  { %v1579_v50 = vadd.f32 %v1578_v26, %v1444_v42  ;;  %v1729_v40 = vsel %vm85_vm0, %v1684_v29, 0.0  ;;  %v1702_v17 = vadd.f32 %v2836_v9, %v1585_v49  ;;  %v1719_v5 = vpop.f32.mrf.mxu1 }
 0x268   :  { %v2819_v39 = vpop.f32.mrf.mxu0  ;;  %1730 = vadd.xlane.f32.xlu0 %v1729_v40 }
 0x269   :  { %v1696_v53 = vadd.f32 %v1695_v36, %v1579_v50  ;;  %v1597_v56 = vadd.f32 %v2819_v39, %v1468_v46  ;;  %v1738_v54 = vsel %vm85_vm0, %v1702_v17, 0.0 }
 0x26a   :  { %v1590_v30 = vpop.f32.mrf.mxu0 }
 0x26b   :  { %v1591_v32 = vadd.f32 %v1590_v30, %v1460_v48  ;;  %v1735_v59 = vsel %vm85_vm0, %v1696_v53, 0.0  ;;  %v1714_v60 = vadd.f32 %v2839_v20, %v1597_v56 }
 0x26c   :  { %v2822_v58 = vpop.f32.mrf.mxu0  ;;  %1739 = vadd.xlane.f32.xlu0 %v1738_v54 }
 0x26d   :  { %v1708_v27 = vadd.f32 %v1707_v28, %v1591_v32  ;;  %v1609_v2 = vadd.f32 %v2822_v58, %v1484_v1  ;;  %v1744_v61 = vsel %vm85_vm0, %v1714_v60, 0.0 }
 0x26e   :  { %v1602_v14 = vpop.f32.mrf.mxu0 }
 0x26f   :  { %v1603_v47 = vadd.f32 %v1602_v14, %v1476_v0  ;;  %v1741_v51 = vsel %vm85_vm0, %v1708_v27, 0.0  ;;  %v1726_v55 = vadd.f32 %v2842_v62, %v1609_v2 }
 0x270   :  { %1742 = vadd.xlane.f32.xlu1 %v1741_v51  ;;  %1736 = vadd.xlane.f32.xlu0 %v1735_v59 }
 0x271   :  { %v1720_v6 = vadd.f32 %v1719_v5, %v1603_v47  ;;  %v1750_v57 = vsel %vm85_vm0, %v1726_v55, 0.0 }
 0x273   :  { %v1747_v8 = vsel %vm85_vm0, %v1720_v6, 0.0 }
 0x274   :  { %1745 = vadd.xlane.f32.xlu0 %v1744_v61  ;;  %1748 = vadd.xlane.f32.xlu1 %v1747_v8  ;;  %v3426_v61 = vld [vmem:[%s3711_s4] ss:$0 sm:$0xff] }
 0x278   :  { %1751 = vadd.xlane.f32.xlu0 %v1750_v57 }
 0x2ef   :  { %v1734_v31 = vpop.xlane.xlu1 %1733 }
 0x2f0   :  { %v1755_v9 = vmul.f32 0.03125, %v1734_v31 }
 0x2f1   :  { %v1731_v33 = vpop.xlane.xlu0 %1730 }
 0x2f2   :  { %v3383_v63 = vsub.f32 %v1690_v38, %v1755_v9  ;;  %v1754_v10 = vmul.f32 0.03125, %v1731_v33 }
 0x2f4   :  { %v3385_v34 = vsub.f32 %v1684_v29, %v1754_v10  ;;  %v1771_v15 = vmul.f32 %v3383_v63, %v3383_v63  ;;  %v3432_v10 = vld [vmem:[%s3712_s5] ss:$0 sm:$0xff] }
 0x2f5   :  { %v1740_v16 = vpop.xlane.xlu0 %1739 }
 0x2f6   :  { %v1757_v35 = vmul.f32 0.03125, %v1740_v16  ;;  %v1781_v36 = vsel %vm85_vm0, %v1771_v15, 0.0  ;;  %v1770_v4 = vmul.f32 %v3385_v34, %v3385_v34 }
 0x2f7   :  { %1782 = vadd.xlane.f32.xlu0 %v1781_v36 }
 0x2f8   :  { %v3392_v25 = vsub.f32 %v1702_v17, %v1757_v35  ;;  %v1778_v37 = vsel %vm85_vm0, %v1770_v4, 0.0 }
 0x2f9   :  { %v1743_v13 = vpop.xlane.xlu1 %1742  ;;  %v1737_v7 = vpop.xlane.xlu0 %1736  ;;  %1779 = vadd.xlane.f32.xlu1 %v1778_v37 }
 0x2fa   :  { %v1758_v11 = vmul.f32 0.03125, %v1743_v13  ;;  %v1756_v18 = vmul.f32 0.03125, %v1737_v7  ;;  %v1773_v19 = vmul.f32 %v3392_v25, %v3392_v25 }
 0x2fc   :  { %v3397_v22 = vsub.f32 %v1708_v27, %v1758_v11  ;;  %v3399_v23 = vsub.f32 %v1696_v53, %v1756_v18  ;;  %v1787_v38 = vsel %vm85_vm0, %v1773_v19, 0.0 }
 0x2fd   :  { %1788 = vadd.xlane.f32.xlu0 %v1787_v38  ;;  %v1746_v12 = vpop.xlane.xlu0 %1745  ;;  %v1749_v20 = vpop.xlane.xlu1 %1748  ;;  %v1889_v38 = vld [vmem:[#allocation3 + $0x8] sm:$0xff] }
 0x2fe   :  { %v1759_v21 = vmul.f32 0.03125, %v1746_v12  ;;  %v1760_v42 = vmul.f32 0.03125, %v1749_v20  ;;  %v1772_v43 = vmul.f32 %v3399_v23, %v3399_v23  ;;  %v1774_v24 = vmul.f32 %v3397_v22, %v3397_v22 }
 0x300   :  { %v3404_v49 = vsub.f32 %v1714_v60, %v1759_v21  ;;  %v3406_v52 = vsub.f32 %v1720_v6, %v1760_v42  ;;  %v1784_v29 = vsel %vm85_vm0, %v1772_v43, 0.0  ;;  %v1790_v28 = vsel %vm85_vm0, %v1774_v24, 0.0  ;;  %v1888_v42 = vld [vmem:[#allocation3] sm:$0xff] }
 0x301   :  { %v1752_v26 = vpop.xlane.xlu0 %1751  ;;  %1785 = vadd.xlane.f32.xlu1 %v1784_v29 }
 0x302   :  { %v1761_v45 = vmul.f32 0.03125, %v1752_v26  ;;  %v1775_v50 = vmul.f32 %v3404_v49, %v3404_v49  ;;  %v1776_v39 = vmul.f32 %v3406_v52, %v3406_v52 }
 0x304   :  { %v3413_v40 = vsub.f32 %v1726_v55, %v1761_v45  ;;  %v1793_v17 = vsel %vm85_vm0, %v1775_v50, 0.0  ;;  %v1796_v46 = vsel %vm85_vm0, %v1776_v39, 0.0  ;;  %v1891_v39 = vld [vmem:[#allocation3 + $0x18] sm:$0xff] }
 0x305   :  { %1794 = vadd.xlane.f32.xlu0 %v1793_v17  ;;  %1791 = vadd.xlane.f32.xlu1 %v1790_v28 }
 0x306   :  { %v1777_v41 = vmul.f32 %v3413_v40, %v3413_v40 }
 0x308   :  { %v1799_v44 = vsel %vm85_vm0, %v1777_v41, 0.0 }
 0x309   :  { %1800 = vadd.xlane.f32.xlu0 %v1799_v44  ;;  %1797 = vadd.xlane.f32.xlu1 %v1796_v46 }
 0x380   :  { %v1783_v48 = vpop.xlane.xlu0 %1782 }
 0x381   :  { %v1803_v30 = vmul.f32 0.03125, %v1783_v48 }
 0x382   :  { %v1780_v53 = vpop.xlane.xlu1 %1779 }
 0x383   :  { %v1811_v56 = vadd.f32 1e-12, %v1803_v30  ;;  %v1802_v32 = vmul.f32 0.03125, %v1780_v53 }
 0x385   :  { %2847 = vrsqrt.f32 %v1811_v56  ;;  %v1810_v54 = vadd.f32 1e-12, %v1802_v32 }
 0x386   :  { %v1789_v62 = vpop.xlane.xlu0 %1788 }
 0x387   :  { %2849 = vrsqrt.f32 %v1810_v54  ;;  %v1805_v58 = vmul.f32 0.03125, %v1789_v62 }
 0x389   :  { %v1813_v1 = vadd.f32 1e-12, %v1805_v58 }
 0x38a   :  { %v1786_v0 = vpop.xlane.xlu1 %1785 }
 0x38b   :  { %2851 = vrsqrt.f32 %v1813_v1  ;;  %v1804_v27 = vmul.f32 0.03125, %v1786_v0  ;;  %v1890_v0 = vld [vmem:[#allocation3 + $0x10] sm:$0xff] }
 0x38d   :  { %v1812_v14 = vadd.f32 1e-12, %v1804_v27 }
 0x38e   :  { %v1795_v59 = vpop.xlane.xlu0 %1794  ;;  %v1792_v2 = vpop.xlane.xlu1 %1791 }
 0x38f   :  { %2853 = vrsqrt.f32 %v1812_v14  ;;  %v1807_v47 = vmul.f32 0.03125, %v1795_v59  ;;  %v1806_v51 = vmul.f32 0.03125, %v1792_v2 }
 0x391   :  { %v1815_v60 = vadd.f32 1e-12, %v1807_v47  ;;  %v1814_v5 = vadd.f32 1e-12, %v1806_v51 }
 0x392   :  { %v2848_v6 = vpop.eup %2847  ;;  %v1801_v8 = vpop.xlane.xlu0 %1800 }
 0x393   :  { %v1798_v55 = vpop.xlane.xlu1 %1797  ;;  %v1827_v57 = vmul.f32 %v2848_v6, %v3383_v63  ;;  %2855 = vrsqrt.f32 %v1815_v60  ;;  %v1809_v31 = vmul.f32 0.03125, %v1801_v8 }
 0x394   :  { %v1808_v9 = vmul.f32 0.03125, %v1798_v55  ;;  %v2850_v33 = vpop.eup %2849  ;;  %2857 = vrsqrt.f32 %v1814_v5  ;;  %v1892_v55 = vld [vmem:[#allocation3 + $0x20] sm:$0xff] }
 0x395   :  { %v1842_v15 = vmul.f32 %v3426_v61, %v1827_v57  ;;  %v1826_v16 = vmul.f32 %v2850_v33, %v3385_v34  ;;  %v1817_v35 = vadd.f32 1e-12, %v1809_v31 }
 0x396   :  { %v1816_v36 = vadd.f32 1e-12, %v1808_v9 }
 0x397   :  { %v1857_v4 = vadd.f32 %v3432_v10, %v1842_v15  ;;  %v1841_v63 = vmul.f32 %v3426_v61, %v1826_v16  ;;  %2859 = vrsqrt.f32 %v1817_v35 }
 0x398   :  { %v2852_v37 = vpop.eup %2851  ;;  %2861 = vrsqrt.f32 %v1816_v36 }
 0x399   :  { %1865 = vst.msk [vmem:[#allocation2 + $0x8] sm:$0xff] %vm85_vm0, %v1857_v4  ;;  %v1856_v13 = vadd.f32 %v3432_v10, %v1841_v63  ;;  %v1829_v7 = vmul.f32 %v2852_v37, %v3392_v25  ;;  %v1895_v37 = vld [vmem:[#allocation3 + $0x38] sm:$0xff] }
 0x39b   :  { %1864 = vst.msk [vmem:[#allocation2] sm:$0xff] %vm85_vm0, %v1856_v13  ;;  %v1844_v11 = vmul.f32 %v3426_v61, %v1829_v7 }
 0x39c   :  { %v2854_v34 = vpop.eup %2853 }
 0x39d   :  { %v1859_v18 = vadd.f32 %v3432_v10, %v1844_v11  ;;  %v1828_v19 = vmul.f32 %v2854_v34, %v3399_v23 }
 0x39f   :  { %1867 = vst.msk [vmem:[#allocation2 + $0x18] sm:$0xff] %vm85_vm0, %v1859_v18  ;;  %v1843_v12 = vmul.f32 %v3426_v61, %v1828_v19  ;;  %v1894_v19 = vld [vmem:[#allocation3 + $0x30] sm:$0xff] }
 0x3a0   :  { %v2856_v20 = vpop.eup %2855  ;;  %v3447_v21 = vld [vmem:[#allocation2 + $0x8] sm:$0xff] }
 0x3a1   :  { %v2858_v43 = vpop.eup %2857  ;;  %v1897_v25 = vsub.f32 %v3447_v21, %v1889_v38  ;;  %v1858_v29 = vadd.f32 %v3432_v10, %v1843_v12  ;;  %v1831_v24 = vmul.f32 %v2856_v20, %v3404_v49 }
 0x3a2   :  { %v3452_v26 = vld [vmem:[#allocation2] sm:$0xff]  ;;  %v1830_v23 = vmul.f32 %v2858_v43, %v3397_v22 }
 0x3a3   :  { %v1905_v45 = vmul.f32 0.5, %v1897_v25  ;;  %v1896_v50 = vsub.f32 %v3452_v26, %v1888_v42  ;;  %1866 = vst.msk [vmem:[#allocation2 + $0x10] sm:$0xff] %vm85_vm0, %v1858_v29  ;;  %v1846_v17 = vmul.f32 %v3426_v61, %v1831_v24 }
 0x3a4   :  { %v2860_v28 = vpop.eup %2859  ;;  %v1845_v41 = vmul.f32 %v3426_v61, %v1830_v23 }
 0x3a5   :  { %v2862_v44 = vpop.eup %2861  ;;  %v1913_v46 = vadd.f32 %v1905_v45, %v1889_v38  ;;  %v1904_v48 = vmul.f32 0.5, %v1896_v50  ;;  %v1861_v49 = vadd.f32 %v3432_v10, %v1846_v17  ;;  %v1833_v30 = vmul.f32 %v2860_v28, %v3413_v40 }
 0x3a6   :  { %v3461_v53 = vld [vmem:[#allocation2 + $0x18] sm:$0xff]  ;;  %v1860_v22 = vadd.f32 %v3432_v10, %v1845_v41  ;;  %v1832_v56 = vmul.f32 %v2862_v44, %v3406_v52 }
 0x3a7   :  { %vm1921_vm9 = vcmp.ge.f32.partialorder %v1913_v46, 1.0  ;;  %v1912_v32 = vadd.f32 %v1904_v48, %v1888_v42  ;;  %v1899_v54 = vsub.f32 %v3461_v53, %v1891_v39  ;;  %1869 = vst.msk [vmem:[#allocation2 + $0x28] sm:$0xff] %vm85_vm0, %v1861_v49  ;;  %v1848_v62 = vmul.f32 %v3426_v61, %v1833_v30 }
 0x3a8   :  { %v1929_v58 = vsel %vm1921_vm9, 1.0, %v2864_v3  ;;  %v1978_v1 = vsel %vm1921_vm9, 0.0, %v1913_v46  ;;  %1868 = vst.msk [vmem:[#allocation2 + $0x20] sm:$0xff] %vm85_vm0, %v1860_v22  ;;  %v1847_v40 = vmul.f32 %v3426_v61, %v1832_v56  ;;  %v1893_v61 = vld [vmem:[#allocation3 + $0x28] sm:$0xff] }
 0x3a9   :  { %v2428_v27 = vpack.c.bf16 %v1929_v58, %v1929_v58  ;;  %1986 = vst.msk [vmem:[#allocation3 + $0x8] sm:$0xff] %vm85_vm0, %v1978_v1  ;;  %vm1920_vm11 = vcmp.ge.f32.partialorder %v1912_v32, 1.0  ;;  %v1907_v52 = vmul.f32 0.5, %v1899_v54  ;;  %v1863_v14 = vadd.f32 %v3432_v10, %v1848_v62 }
 0x3aa   :  { %v1928_v59 = vsel %vm1920_vm11, 1.0, %v2864_v3  ;;  %v1977_v2 = vsel %vm1920_vm11, 0.0, %v1912_v32  ;;  %v3474_v47 = vld [vmem:[#allocation2 + $0x10] sm:$0xff]  ;;  %v1862_v51 = vadd.f32 %v3432_v10, %v1847_v40 }
 0x3ab   :  { %1970 = vst.msk [vmem:[%s3713_s6 + $0x4] sm:$0xf] %vm1968_vm10, %v2428_v27  ;;  %v2427_v60 = vpack.c.bf16 %v1928_v59, %v1928_v59  ;;  %v1915_v5 = vadd.f32 %v1907_v52, %v1891_v39  ;;  %v1898_v6 = vsub.f32 %v3474_v47, %v1890_v0 }
 0x3ac   :  { %1985 = vst.msk [vmem:[#allocation3] sm:$0xff] %vm85_vm0, %v1977_v2  ;;  %1871 = vst.msk [vmem:[#allocation2 + $0x38] sm:$0xff] %vm85_vm0, %v1863_v14 }
 0x3ad   :  { %1870 = vst.msk [vmem:[#allocation2 + $0x30] sm:$0xff] %vm85_vm0, %v1862_v51  ;;  %vm1923_vm12 = vcmp.ge.f32.partialorder %v1915_v5, 1.0  ;;  %v1906_v8 = vmul.f32 0.5, %v1898_v6 }
 0x3ae   :  { %1969 = vst.msk [vmem:[%s3713_s6] sm:$0xf] %vm1968_vm10, %v2427_v60  ;;  %v1931_v57 = vsel %vm1923_vm12, 1.0, %v2864_v3  ;;  %v1980_v31 = vsel %vm1923_vm12, 0.0, %v1915_v5  ;;  %v3490_v9 = vld [vmem:[#allocation2 + $0x28] sm:$0xff] }
 0x3af   :  { %v2430_v33 = vpack.c.bf16 %v1931_v57, %v1931_v57  ;;  %1988 = vst.msk [vmem:[#allocation3 + $0x18] sm:$0xff] %vm85_vm0, %v1980_v31  ;;  %v1914_v10 = vadd.f32 %v1906_v8, %v1890_v0  ;;  %v1901_v15 = vsub.f32 %v3490_v9, %v1893_v61  ;;  %v3494_v16 = vld [vmem:[#allocation2 + $0x20] sm:$0xff] }
 0x3b0   :  { %v2002_v35 = vld [vmem:[#allocation3 + $0x8] sm:$0xff]  ;;  %v1900_v36 = vsub.f32 %v3494_v16, %v1892_v55 }
 0x3b1   :  { %v2010_v4 = vsub.f32 %v3447_v21, %v2002_v35  ;;  %1972 = vst.msk [vmem:[%s3713_s6 + $0xc] sm:$0xf] %vm1968_vm10, %v2430_v33  ;;  %vm1922_vm13 = vcmp.ge.f32.partialorder %v1914_v10, 1.0  ;;  %v1909_v63 = vmul.f32 0.5, %v1901_v15 }
 0x3b2   :  { %v1930_v7 = vsel %vm1922_vm13, 1.0, %v2864_v3  ;;  %v1979_v11 = vsel %vm1922_vm13, 0.0, %v1914_v10  ;;  %v1908_v34 = vmul.f32 0.5, %v1900_v36 }
 0x3b3   :  { %v2001_v13 = vld [vmem:[#allocation3] sm:$0xff]  ;;  %v3503_v18 = vld [vmem:[#allocation2 + $0x38] sm:$0xff]  ;;  %v2018_v38 = vmul.f32 0.5, %v2010_v4  ;;  %v2429_v20 = vpack.c.bf16 %v1930_v7, %v1930_v7  ;;  %1987 = vst.msk [vmem:[#allocation3 + $0x10] sm:$0xff] %vm85_vm0, %v1979_v11  ;;  %v1917_v42 = vadd.f32 %v1909_v63, %v1893_v61 }
 0x3b4   :  { %v2009_v12 = vsub.f32 %v3452_v26, %v2001_v13  ;;  %v3507_v43 = vld [vmem:[#allocation2 + $0x30] sm:$0xff]  ;;  %v1916_v25 = vadd.f32 %v1908_v34, %v1892_v55  ;;  %v1903_v29 = vsub.f32 %v3503_v18, %v1895_v37 }
 0x3b5   :  { %v2026_v24 = vadd.f32 %v2018_v38, %v2002_v35  ;;  %1971 = vst.msk [vmem:[%s3713_s6 + $0x8] sm:$0xf] %vm1968_vm10, %v2429_v20  ;;  %vm1925_vm14 = vcmp.ge.f32.partialorder %v1917_v42, 1.0  ;;  %v1902_v45 = vsub.f32 %v3507_v43, %v1894_v19 }
 0x3b6   :  { %v2017_v23 = vmul.f32 0.5, %v2009_v12  ;;  %v2004_v50 = vld [vmem:[#allocation3 + $0x18] sm:$0xff]  ;;  %v1933_v17 = vsel %vm1925_vm14, 1.0, %v2864_v3  ;;  %v1982_v28 = vsel %vm1925_vm14, 0.0, %v1917_v42  ;;  %vm1924_vm15 = vcmp.ge.f32.partialorder %v1916_v25, 1.0 }
 0x3b7   :  { %v1911_v39 = vmul.f32 0.5, %v1903_v29  ;;  %vm2034_vm1 = vcmp.ge.f32.partialorder %v2026_v24, 1.0  ;;  %v2012_v44 = vsub.f32 %v3461_v53, %v2004_v50  ;;  %v2432_v46 = vpack.c.bf16 %v1933_v17, %v1933_v17  ;;  %1990 = vst.msk [vmem:[#allocation3 + $0x28] sm:$0xff] %vm85_vm0, %v1982_v28 }
 0x3b8   :  { %v2025_v41 = vadd.f32 %v2017_v23, %v2001_v13  ;;  %v2042_v48 = vsel %vm2034_vm1, 1.0, %v2864_v3  ;;  %v2091_v49 = vsel %vm2034_vm1, 0.0, %v2026_v24  ;;  %v1932_v30 = vsel %vm1924_vm15, 1.0, %v2864_v3 }
 0x3b9   :  { %v1981_v22 = vsel %vm1924_vm15, 0.0, %v1916_v25  ;;  %v2436_v56 = vpack.c.bf16 %v2042_v48, %v2042_v48  ;;  %2099 = vst.msk [vmem:[#allocation3 + $0x8] sm:$0xff] %vm85_vm0, %v2091_v49  ;;  %v2020_v32 = vmul.f32 0.5, %v2012_v44  ;;  %v2431_v54 = vpack.c.bf16 %v1932_v30, %v1932_v30 }
 0x3ba   :  { %vm2033_vm2 = vcmp.ge.f32.partialorder %v2025_v41, 1.0  ;;  %1974 = vst.msk [vmem:[%s3713_s6 + $0x14] sm:$0xf] %vm1968_vm10, %v2432_v46  ;;  %v2003_v1 = vld [vmem:[#allocation3 + $0x10] sm:$0xff]  ;;  %v1919_v0 = vadd.f32 %v1911_v39, %v1895_v37  ;;  %v1910_v40 = vmul.f32 0.5, %v1902_v45 }
 0x3bb   :  { %1989 = vst.msk [vmem:[#allocation3 + $0x20] sm:$0xff] %vm85_vm0, %v1981_v22  ;;  %v2041_v62 = vsel %vm2033_vm2, 1.0, %v2864_v3  ;;  %v2090_v58 = vsel %vm2033_vm2, 0.0, %v2025_v41  ;;  %v2028_v52 = vadd.f32 %v2020_v32, %v2004_v50  ;;  %v2011_v14 = vsub.f32 %v3474_v47, %v2003_v1 }
 0x3bc   :  { %2388 = vst.msk [vmem:[%s3713_s6 + $0x24] sm:$0xf] %vm1968_vm10, %v2436_v56  ;;  %v2435_v27 = vpack.c.bf16 %v2041_v62, %v2041_v62  ;;  %1973 = vst.msk [vmem:[%s3713_s6 + $0x10] sm:$0xf] %vm1968_vm10, %v2431_v54  ;;  %vm1927_vm3 = vcmp.ge.f32.partialorder %v1919_v0, 1.0  ;;  %v1918_v59 = vadd.f32 %v1910_v40, %v1894_v19 }
 0x3bd   :  { %2098 = vst.msk [vmem:[#allocation3] sm:$0xff] %vm85_vm0, %v2090_v58  ;;  %vm2036_vm4 = vcmp.ge.f32.partialorder %v2028_v52, 1.0  ;;  %v2019_v2 = vmul.f32 0.5, %v2011_v14  ;;  %v1935_v51 = vsel %vm1927_vm3, 1.0, %v2864_v3  ;;  %v1984_v60 = vsel %vm1927_vm3, 0.0, %v1919_v0 }
 0x3be   :  { %2387 = vst.msk [vmem:[%s3713_s6 + $0x20] sm:$0xf] %vm1968_vm10, %v2435_v27  ;;  %v2044_v5 = vsel %vm2036_vm4, 1.0, %v2864_v3  ;;  %v2093_v6 = vsel %vm2036_vm4, 0.0, %v2028_v52  ;;  %v2006_v61 = vld [vmem:[#allocation3 + $0x28] sm:$0xff]  ;;  %v2434_v8 = vpack.c.bf16 %v1935_v51, %v1935_v51  ;;  %vm1926_vm5 = vcmp.ge.f32.partialorder %v1918_v59, 1.0 }
 0x3bf   :  { %1992 = vst.msk [vmem:[#allocation3 + $0x38] sm:$0xff] %vm85_vm0, %v1984_v60  ;;  %v2438_v55 = vpack.c.bf16 %v2044_v5, %v2044_v5  ;;  %2101 = vst.msk [vmem:[#allocation3 + $0x18] sm:$0xff] %vm85_vm0, %v2093_v6  ;;  %v2027_v57 = vadd.f32 %v2019_v2, %v2003_v1  ;;  %v2014_v31 = vsub.f32 %v3490_v9, %v2006_v61  ;;  %v1934_v33 = vsel %vm1926_vm5, 1.0, %v2864_v3 }
 0x3c0   :  { %v2115_v10 = vld [vmem:[#allocation3 + $0x8] sm:$0xff]  ;;  %1976 = vst.msk [vmem:[%s3713_s6 + $0x1c] sm:$0xf] %vm1968_vm10, %v2434_v8  ;;  %v2433_v35 = vpack.c.bf16 %v1934_v33, %v1934_v33  ;;  %v1983_v36 = vsel %vm1926_vm5, 0.0, %v1918_v59 }
 0x3c1   :  { %v2123_v4 = vsub.f32 %v3447_v21, %v2115_v10  ;;  %2390 = vst.msk [vmem:[%s3713_s6 + $0x2c] sm:$0xf] %vm1968_vm10, %v2438_v55  ;;  %vm2035_vm6 = vcmp.ge.f32.partialorder %v2027_v57, 1.0  ;;  %v2022_v63 = vmul.f32 0.5, %v2014_v31 }
 0x3c2   :  { %v2005_v15 = vld [vmem:[#allocation3 + $0x20] sm:$0xff]  ;;  %1991 = vst.msk [vmem:[#allocation3 + $0x30] sm:$0xff] %vm85_vm0, %v1983_v36  ;;  %v2043_v7 = vsel %vm2035_vm6, 1.0, %v2864_v3  ;;  %v2092_v11 = vsel %vm2035_vm6, 0.0, %v2027_v57 }
 0x3c3   :  { %v2013_v37 = vsub.f32 %v3494_v16, %v2005_v15  ;;  %1975 = vst.msk [vmem:[%s3713_s6 + $0x18] sm:$0xf] %vm1968_vm10, %v2433_v35  ;;  %v2131_v34 = vmul.f32 0.5, %v2123_v4  ;;  %v2437_v38 = vpack.c.bf16 %v2043_v7, %v2043_v7  ;;  %v2030_v12 = vadd.f32 %v2022_v63, %v2006_v61 }
 0x3c4   :  { %v2114_v13 = vld [vmem:[#allocation3] sm:$0xff]  ;;  %2100 = vst.msk [vmem:[#allocation3 + $0x10] sm:$0xff] %vm85_vm0, %v2092_v11 }
 0x3c5   :  { %v2122_v19 = vsub.f32 %v3452_v26, %v2114_v13  ;;  %v2021_v20 = vmul.f32 0.5, %v2013_v37  ;;  %v2139_v42 = vadd.f32 %v2131_v34, %v2115_v10  ;;  %2389 = vst.msk [vmem:[%s3713_s6 + $0x28] sm:$0xf] %vm1968_vm10, %v2437_v38  ;;  %vm2038_vm7 = vcmp.ge.f32.partialorder %v2030_v12, 1.0 }
 0x3c6   :  { %v2008_v29 = vld [vmem:[#allocation3 + $0x38] sm:$0xff]  ;;  %v2046_v23 = vsel %vm2038_vm7, 1.0, %v2864_v3  ;;  %v2095_v45 = vsel %vm2038_vm7, 0.0, %v2030_v12 }
 0x3c7   :  { %v2130_v25 = vmul.f32 0.5, %v2122_v19  ;;  %v2117_v24 = vld [vmem:[#allocation3 + $0x18] sm:$0xff]  ;;  %v2029_v50 = vadd.f32 %v2021_v20, %v2005_v15  ;;  %v2016_v17 = vsub.f32 %v3503_v18, %v2008_v29  ;;  %vm2147_vm8 = vcmp.ge.f32.partialorder %v2139_v42, 1.0  ;;  %2103 = vst.msk [vmem:[#allocation3 + $0x28] sm:$0xff] %vm85_vm0, %v2095_v45 }
 0x3c8   :  { %v2125_v39 = vsub.f32 %v3461_v53, %v2117_v24  ;;  %v2440_v41 = vpack.c.bf16 %v2046_v23, %v2046_v23  ;;  %v2155_v44 = vsel %vm2147_vm8, 1.0, %v2864_v3  ;;  %v2204_v46 = vsel %vm2147_vm8, 0.0, %v2139_v42 }
 0x3c9   :  { %v2138_v28 = vadd.f32 %v2130_v25, %v2114_v13  ;;  %vm2037_vm9 = vcmp.ge.f32.partialorder %v2029_v50, 1.0  ;;  %v2024_v48 = vmul.f32 0.5, %v2016_v17  ;;  %v2444_v49 = vpack.c.bf16 %v2155_v44, %v2155_v44  ;;  %2212 = vst.msk [vmem:[#allocation3 + $0x8] sm:$0xff] %vm85_vm0, %v2204_v46  ;;  %v2007_v56 = vld [vmem:[#allocation3 + $0x30] sm:$0xff] }
 0x3ca   :  { %v2133_v30 = vmul.f32 0.5, %v2125_v39  ;;  %2392 = vst.msk [vmem:[%s3713_s6 + $0x34] sm:$0xf] %vm1968_vm10, %v2440_v41  ;;  %v2045_v22 = vsel %vm2037_vm9, 1.0, %v2864_v3  ;;  %v2094_v1 = vsel %vm2037_vm9, 0.0, %v2029_v50  ;;  %v2015_v14 = vsub.f32 %v3507_v43, %v2007_v56 }
 0x3cb   :  { %vm2146_vm11 = vcmp.ge.f32.partialorder %v2138_v28, 1.0  ;;  %v2116_v62 = vld [vmem:[#allocation3 + $0x10] sm:$0xff]  ;;  %v2439_v58 = vpack.c.bf16 %v2045_v22, %v2045_v22  ;;  %2404 = vst.msk [vmem:[%s3713_s6 + $0x44] sm:$0xf] %vm1968_vm10, %v2444_v49  ;;  %v2032_v52 = vadd.f32 %v2024_v48, %v2008_v29 }
 0x3cc   :  { %v2154_v32 = vsel %vm2146_vm11, 1.0, %v2864_v3  ;;  %v2203_v54 = vsel %vm2146_vm11, 0.0, %v2138_v28  ;;  %v2141_v40 = vadd.f32 %v2133_v30, %v2117_v24  ;;  %v2124_v27 = vsub.f32 %v3474_v47, %v2116_v62  ;;  %2102 = vst.msk [vmem:[#allocation3 + $0x20] sm:$0xff] %vm85_vm0, %v2094_v1 }
 0x3cd   :  { %v2443_v0 = vpack.c.bf16 %v2154_v32, %v2154_v32  ;;  %2211 = vst.msk [vmem:[#allocation3] sm:$0xff] %vm85_vm0, %v2203_v54  ;;  %vm2040_vm13 = vcmp.ge.f32.partialorder %v2032_v52, 1.0  ;;  %v2023_v33 = vmul.f32 0.5, %v2015_v14 }
 0x3ce   :  { %2391 = vst.msk [vmem:[%s3713_s6 + $0x30] sm:$0xf] %vm1968_vm10, %v2439_v58  ;;  %vm2149_vm12 = vcmp.ge.f32.partialorder %v2141_v40, 1.0  ;;  %v2132_v59 = vmul.f32 0.5, %v2124_v27  ;;  %v2119_v60 = vld [vmem:[#allocation3 + $0x28] sm:$0xff]  ;;  %v2048_v5 = vsel %vm2040_vm13, 1.0, %v2864_v3 }
 0x3cf   :  { %2403 = vst.msk [vmem:[%s3713_s6 + $0x40] sm:$0xf] %vm1968_vm10, %v2443_v0  ;;  %v2157_v2 = vsel %vm2149_vm12, 1.0, %v2864_v3  ;;  %v2206_v51 = vsel %vm2149_vm12, 0.0, %v2141_v40  ;;  %v2097_v6 = vsel %vm2040_vm13, 0.0, %v2032_v52  ;;  %v2127_v55 = vsub.f32 %v3490_v9, %v2119_v60 }
 0x3d0   :  { %v2446_v61 = vpack.c.bf16 %v2157_v2, %v2157_v2  ;;  %2214 = vst.msk [vmem:[#allocation3 + $0x18] sm:$0xff] %vm85_vm0, %v2206_v51  ;;  %v2140_v8 = vadd.f32 %v2132_v59, %v2116_v62  ;;  %v2442_v57 = vpack.c.bf16 %v2048_v5, %v2048_v5  ;;  %2105 = vst.msk [vmem:[#allocation3 + $0x38] sm:$0xff] %vm85_vm0, %v2097_v6  ;;  %v2228_v31 = vld [vmem:[#allocation3 + $0x8] sm:$0xff] }
 0x3d1   :  { %v2236_v10 = vsub.f32 %v3447_v21, %v2228_v31  ;;  %v2135_v15 = vmul.f32 0.5, %v2127_v55  ;;  %v2031_v37 = vadd.f32 %v2023_v33, %v2007_v56 }
 0x3d2   :  { %2406 = vst.msk [vmem:[%s3713_s6 + $0x4c] sm:$0xf] %vm1968_vm10, %v2446_v61  ;;  %vm2148_vm14 = vcmp.ge.f32.partialorder %v2140_v8, 1.0  ;;  %2394 = vst.msk [vmem:[%s3713_s6 + $0x3c] sm:$0xf] %vm1968_vm10, %v2442_v57 }
 0x3d3   :  { %v2156_v36 = vsel %vm2148_vm14, 1.0, %v2864_v3  ;;  %v2205_v4 = vsel %vm2148_vm14, 0.0, %v2140_v8  ;;  %v2118_v63 = vld [vmem:[#allocation3 + $0x20] sm:$0xff]  ;;  %v2244_v13 = vmul.f32 0.5, %v2236_v10  ;;  %v2143_v11 = vadd.f32 %v2135_v15, %v2119_v60 }
 0x3d4   :  { %v2227_v35 = vld [vmem:[#allocation3] sm:$0xff]  ;;  %v2445_v7 = vpack.c.bf16 %v2156_v36, %v2156_v36  ;;  %2213 = vst.msk [vmem:[#allocation3 + $0x10] sm:$0xff] %vm85_vm0, %v2205_v4  ;;  %v2126_v34 = vsub.f32 %v3494_v16, %v2118_v63  ;;  %vm2039_vm15 = vcmp.ge.f32.partialorder %v2031_v37, 1.0 }
 0x3d5   :  { %v2235_v21 = vsub.f32 %v3452_v26, %v2227_v35  ;;  %v2252_v19 = vadd.f32 %v2244_v13, %v2228_v31  ;;  %vm2151_vm1 = vcmp.ge.f32.partialorder %v2143_v11, 1.0  ;;  %v2047_v12 = vsel %vm2039_vm15, 1.0, %v2864_v3 }
 0x3d6   :  { %2405 = vst.msk [vmem:[%s3713_s6 + $0x48] sm:$0xf] %vm1968_vm10, %v2445_v7  ;;  %v2159_v26 = vsel %vm2151_vm1, 1.0, %v2864_v3  ;;  %v2208_v42 = vsel %vm2151_vm1, 0.0, %v2143_v11  ;;  %v2134_v25 = vmul.f32 0.5, %v2126_v34  ;;  %v2441_v24 = vpack.c.bf16 %v2047_v12, %v2047_v12 }
 0x3d7   :  { %v2243_v38 = vmul.f32 0.5, %v2235_v21  ;;  %v2230_v20 = vld [vmem:[#allocation3 + $0x18] sm:$0xff]  ;;  %vm2260_vm2 = vcmp.ge.f32.partialorder %v2252_v19, 1.0  ;;  %v2448_v50 = vpack.c.bf16 %v2159_v26, %v2159_v26  ;;  %2216 = vst.msk [vmem:[#allocation3 + $0x28] sm:$0xff] %vm85_vm0, %v2208_v42 }
 0x3d8   :  { %v2121_v29 = vld [vmem:[#allocation3 + $0x38] sm:$0xff]  ;;  %v2238_v45 = vsub.f32 %v3461_v53, %v2230_v20  ;;  %v2268_v17 = vsel %vm2260_vm2, 1.0, %v2864_v3  ;;  %v2317_v28 = vsel %vm2260_vm2, 0.0, %v2252_v19  ;;  %v2142_v39 = vadd.f32 %v2134_v25, %v2118_v63  ;;  %2393 = vst.msk [vmem:[%s3713_s6 + $0x38] sm:$0xf] %vm1968_vm10, %v2441_v24 }
 0x3d9   :  { %v2251_v23 = vadd.f32 %v2243_v38, %v2227_v35  ;;  %v2129_v41 = vsub.f32 %v3503_v18, %v2121_v29  ;;  %v2452_v44 = vpack.c.bf16 %v2268_v17, %v2268_v17  ;;  %2325 = vst.msk [vmem:[#allocation3 + $0x8] sm:$0xff] %vm85_vm0, %v2317_v28  ;;  %v2096_v53 = vsel %vm2039_vm15, 0.0, %v2031_v37 }
 0x3da   :  { %v2246_v46 = vmul.f32 0.5, %v2238_v45  ;;  %2408 = vst.msk [vmem:[%s3713_s6 + $0x54] sm:$0xf] %vm1968_vm10, %v2448_v50  ;;  %vm2150_vm4 = vcmp.ge.f32.partialorder %v2142_v39, 1.0 }
 0x3db   :  { %vm2259_vm3 = vcmp.ge.f32.partialorder %v2251_v23, 1.0  ;;  %v2229_v30 = vld [vmem:[#allocation3 + $0x10] sm:$0xff]  ;;  %v2137_v22 = vmul.f32 0.5, %v2129_v41  ;;  %2104 = vst.msk [vmem:[#allocation3 + $0x30] sm:$0xff] %vm85_vm0, %v2096_v53  ;;  %v2158_v62 = vsel %vm2150_vm4, 1.0, %v2864_v3  ;;  %v2207_v1 = vsel %vm2150_vm4, 0.0, %v2142_v39 }
 0x3dc   :  { %v2267_v48 = vsel %vm2259_vm3, 1.0, %v2864_v3  ;;  %v2316_v49 = vsel %vm2259_vm3, 0.0, %v2251_v23  ;;  %2420 = vst.msk [vmem:[%s3713_s6 + $0x64] sm:$0xf] %vm1968_vm10, %v2452_v44  ;;  %v2254_v32 = vadd.f32 %v2246_v46, %v2230_v20  ;;  %v2237_v54 = vsub.f32 %v3474_v47, %v2229_v30 }
 0x3dd   :  { %v2451_v56 = vpack.c.bf16 %v2267_v48, %v2267_v48  ;;  %2324 = vst.msk [vmem:[#allocation3] sm:$0xff] %vm85_vm0, %v2316_v49  ;;  %v2447_v58 = vpack.c.bf16 %v2158_v62, %v2158_v62  ;;  %v2145_v0 = vadd.f32 %v2137_v22, %v2121_v29  ;;  %2215 = vst.msk [vmem:[#allocation3 + $0x20] sm:$0xff] %vm85_vm0, %v2207_v1 }
 0x3de   :  { %vm2262_vm5 = vcmp.ge.f32.partialorder %v2254_v32, 1.0  ;;  %v2245_v40 = vmul.f32 0.5, %v2237_v54  ;;  %v2232_v14 = vld [vmem:[#allocation3 + $0x28] sm:$0xff] }
 0x3df   :  { %2419 = vst.msk [vmem:[%s3713_s6 + $0x60] sm:$0xf] %vm1968_vm10, %v2451_v56  ;;  %v2270_v27 = vsel %vm2262_vm5, 1.0, %v2864_v3  ;;  %v2319_v52 = vsel %vm2262_vm5, 0.0, %v2254_v32  ;;  %2407 = vst.msk [vmem:[%s3713_s6 + $0x50] sm:$0xf] %vm1968_vm10, %v2447_v58  ;;  %v2240_v2 = vsub.f32 %v3490_v9, %v2232_v14 }
 0x3e0   :  { %vm2153_vm6 = vcmp.ge.f32.partialorder %v2145_v0, 1.0  ;;  %v2454_v47 = vpack.c.bf16 %v2270_v27, %v2270_v27  ;;  %2327 = vst.msk [vmem:[#allocation3 + $0x18] sm:$0xff] %vm85_vm0, %v2319_v52  ;;  %v2253_v59 = vadd.f32 %v2245_v40, %v2229_v30 }
 0x3e1   :  { %v2161_v51 = vsel %vm2153_vm6, 1.0, %v2864_v3  ;;  %v2210_v5 = vsel %vm2153_vm6, 0.0, %v2145_v0  ;;  %v2248_v6 = vmul.f32 0.5, %v2240_v2 }
 0x3e2   :  { %v2450_v60 = vpack.c.bf16 %v2161_v51, %v2161_v51  ;;  %2422 = vst.msk [vmem:[%s3713_s6 + $0x6c] sm:$0xf] %vm1968_vm10, %v2454_v47  ;;  %vm2261_vm7 = vcmp.ge.f32.partialorder %v2253_v59, 1.0  ;;  %v2120_v61 = vld [vmem:[#allocation3 + $0x30] sm:$0xff] }
 0x3e3   :  { %2218 = vst.msk [vmem:[#allocation3 + $0x38] sm:$0xff] %vm85_vm0, %v2210_v5  ;;  %v2269_v8 = vsel %vm2261_vm7, 1.0, %v2864_v3  ;;  %v2318_v55 = vsel %vm2261_vm7, 0.0, %v2253_v59  ;;  %v2128_v9 = vsub.f32 %v3507_v43, %v2120_v61  ;;  %v2256_v31 = vadd.f32 %v2248_v6, %v2232_v14 }
 0x3e4   :  { %2410 = vst.msk [vmem:[%s3713_s6 + $0x5c] sm:$0xf] %vm1968_vm10, %v2450_v60  ;;  %v2453_v57 = vpack.c.bf16 %v2269_v8, %v2269_v8  ;;  %v2231_v33 = vld [vmem:[#allocation3 + $0x20] sm:$0xff] }
 0x3e5   :  { %2326 = vst.msk [vmem:[#allocation3 + $0x10] sm:$0xff] %vm85_vm0, %v2318_v55  ;;  %v2136_v10 = vmul.f32 0.5, %v2128_v9  ;;  %vm2264_vm8 = vcmp.ge.f32.partialorder %v2256_v31, 1.0  ;;  %v2239_v15 = vsub.f32 %v3494_v16, %v2231_v33 }
 0x3e6   :  { %2421 = vst.msk [vmem:[%s3713_s6 + $0x68] sm:$0xf] %vm1968_vm10, %v2453_v57  ;;  %v2272_v35 = vsel %vm2264_vm8, 1.0, %v2864_v3  ;;  %v2321_v36 = vsel %vm2264_vm8, 0.0, %v2256_v31 }
 0x3e7   :  { %v2144_v4 = vadd.f32 %v2136_v10, %v2120_v61  ;;  %v2456_v63 = vpack.c.bf16 %v2272_v35, %v2272_v35  ;;  %2329 = vst.msk [vmem:[#allocation3 + $0x28] sm:$0xff] %vm85_vm0, %v2321_v36  ;;  %v2247_v37 = vmul.f32 0.5, %v2239_v15 }
 0x3e9   :  { %vm2152_vm9 = vcmp.ge.f32.partialorder %v2144_v4, 1.0  ;;  %2424 = vst.msk [vmem:[%s3713_s6 + $0x74] sm:$0xf] %vm1968_vm10, %v2456_v63  ;;  %v2255_v21 = vadd.f32 %v2247_v37, %v2231_v33 }
 0x3ea   :  { %v2234_v13 = vld [vmem:[#allocation3 + $0x38] sm:$0xff]  ;;  %v2160_v16 = vsel %vm2152_vm9, 1.0, %v2864_v3  ;;  %v2209_v11 = vsel %vm2152_vm9, 0.0, %v2144_v4 }
 0x3eb   :  { %v2242_v7 = vsub.f32 %v3503_v18, %v2234_v13  ;;  %v2449_v34 = vpack.c.bf16 %v2160_v16, %v2160_v16  ;;  %2217 = vst.msk [vmem:[#allocation3 + $0x30] sm:$0xff] %vm85_vm0, %v2209_v11  ;;  %vm2263_vm11 = vcmp.ge.f32.partialorder %v2255_v21, 1.0 }
 0x3ec   :  { %v2271_v38 = vsel %vm2263_vm11, 1.0, %v2864_v3  ;;  %v2320_v12 = vsel %vm2263_vm11, 0.0, %v2255_v21 }
 0x3ed   :  { %v2250_v19 = vmul.f32 0.5, %v2242_v7  ;;  %2409 = vst.msk [vmem:[%s3713_s6 + $0x58] sm:$0xf] %vm1968_vm10, %v2449_v34  ;;  %v2455_v20 = vpack.c.bf16 %v2271_v38, %v2271_v38 }
 0x3ee   :  { %2328 = vst.msk [vmem:[#allocation3 + $0x20] sm:$0xff] %vm85_vm0, %v2320_v12 }
 0x3ef   :  { %v2258_v18 = vadd.f32 %v2250_v19, %v2234_v13  ;;  %2423 = vst.msk [vmem:[%s3713_s6 + $0x70] sm:$0xf] %vm1968_vm10, %v2455_v20 }
 0x3f1   :  { %vm2266_vm12 = vcmp.ge.f32.partialorder %v2258_v18, 1.0 }
 0x3f2   :  { %v2274_v26 = vsel %vm2266_vm12, 1.0, %v2864_v3  ;;  %v2323_v42 = vsel %vm2266_vm12, 0.0, %v2258_v18  ;;  %v2233_v29 = vld [vmem:[#allocation3 + $0x30] sm:$0xff] }
 0x3f3   :  { %v2458_v25 = vpack.c.bf16 %v2274_v26, %v2274_v26  ;;  %2331 = vst.msk [vmem:[#allocation3 + $0x38] sm:$0xff] %vm85_vm0, %v2323_v42  ;;  %v2241_v24 = vsub.f32 %v3507_v43, %v2233_v29 }
 0x3f5   :  { %2426 = vst.msk [vmem:[%s3713_s6 + $0x7c] sm:$0xf] %vm1968_vm10, %v2458_v25  ;;  %v2249_v23 = vmul.f32 0.5, %v2241_v24 }
 0x3f7   :  { %v2257_v45 = vadd.f32 %v2249_v23, %v2233_v29 }
 0x3f9   :  { %vm2265_vm13 = vcmp.ge.f32.partialorder %v2257_v45, 1.0 }
 0x3fa   :  { %v2273_v50 = vsel %vm2265_vm13, 1.0, %v2864_v3  ;;  %v2322_v17 = vsel %vm2265_vm13, 0.0, %v2257_v45 }
 0x3fb   :  { %v2457_v28 = vpack.c.bf16 %v2273_v50, %v2273_v50  ;;  %2330 = vst.msk [vmem:[#allocation3 + $0x30] sm:$0xff] %vm85_vm0, %v2322_v17 }
 0x3fd   :  { %2425 = vst.msk [vmem:[%s3713_s6 + $0x78] sm:$0xf] %vm1968_vm10, %v2457_v28 }

</bundles_post_ra>
